<compile_context>
chip_gen: v7x
topology: tpu7x:2x2x1
jax: 0.10.0
libtpu: 0.0.40
codegen_flags: <defaults>
</compile_context>

<pallas_src>
import jax
import jax.numpy as jnp
from jax.experimental import pallas as pl
from jax.experimental.pallas import tpu as pltpu


def mlp_kernel(x_ref,
               w1_ref, b1_ref,
               w2_ref, b2_ref,
               w3_ref, b3_ref,
               w4_ref, b4_ref,
               o_ref):
    cdt = w1_ref.dtype  # matmul operand dtype (f32 or bf16); accumulation is f32.

    # fc1 + relu   (MXU matmul, f32 accumulate; bias/ReLU in f32)
    h = jnp.dot(x_ref[...], w1_ref[...], preferred_element_type=jnp.float32)
    h = jnp.maximum(h + b1_ref[...], 0.0)
    # fc2 + relu
    h = jnp.dot(h.astype(cdt), w2_ref[...], preferred_element_type=jnp.float32)
    h = jnp.maximum(h + b2_ref[...], 0.0)
    # fc3 + relu
    h = jnp.dot(h.astype(cdt), w3_ref[...], preferred_element_type=jnp.float32)
    h = jnp.maximum(h + b3_ref[...], 0.0)

    # output layer (single neuron): VPU multiply + reduce instead of an N=1
    # MXU matmul; bias is a scalar read from SMEM.
    z = jnp.sum(h * w4_ref[...], axis=-1) + b4_ref[0, 0]          # (tile,)
    # Lane-dense store: batch lives on the lane axis of the (1, tile) block.
    o_ref[...] = jax.nn.sigmoid(z)[None, :].astype(o_ref.dtype)


def _round_up(n, m):
    return ((n + m - 1) // m) * m


def mymodel_forward(x, params, *, batch_tile=256, matmul_dtype=jnp.float32):
    """x: (B, input_size) f32. params: dict of (in,out) weights + (1,out)/(1,1) biases."""
    B, F = x.shape
    cdt = jnp.dtype(matmul_dtype)

    # Pick a batch tile: multiple of 8 (sublanes), capped by the (padded) batch.
    bt = _round_up(min(batch_tile, _round_up(B, 8)), 8)
    Bp = _round_up(B, bt)

    x_p = x if Bp == B else jnp.pad(x, ((0, Bp - B), (0, 0)))
    x_p = x_p.astype(cdt)

    w1 = params["w1"].astype(cdt)
    w2 = params["w2"].astype(cdt)
    w3 = params["w3"].astype(cdt)
    b1 = params["b1"].astype(jnp.float32)
    b2 = params["b2"].astype(jnp.float32)
    b3 = params["b3"].astype(jnp.float32)
    # Final layer: keep f32 (VPU path); weight as a (1, 32) row, bias as scalar.
    w4 = params["w4"].astype(jnp.float32).reshape(1, -1)
    b4 = params["b4"].astype(jnp.float32).reshape(1, 1)

    grid = (Bp // bt,)

    def invariant(shape):
        # Grid-invariant full-array block (weights / biases stay resident).
        return pl.BlockSpec(shape, lambda i: (0,) * len(shape))

    out = pl.pallas_call(
        mlp_kernel,
        out_shape=jax.ShapeDtypeStruct((1, Bp), jnp.float32),
        grid_spec=pltpu.PrefetchScalarGridSpec(
            num_scalar_prefetch=0,
            grid=grid,
            in_specs=[
                pl.BlockSpec((bt, F), lambda i: (i, 0)),      # streamed x tiles
                invariant(w1.shape), invariant(b1.shape),
                invariant(w2.shape), invariant(b2.shape),
                invariant(w3.shape), invariant(b3.shape),
                invariant(w4.shape),
                pl.BlockSpec(memory_space=pltpu.MemorySpace.SMEM),  # scalar b4
            ],
            # Lane-dense output: (1, bt) blocks along the lane axis.
            out_specs=pl.BlockSpec((1, bt), lambda i: (0, i)),
        ),
        compiler_params=pltpu.CompilerParams(
            dimension_semantics=("parallel",)),
    )(x_p, w1, b1, w2, b2, w3, b3, w4, b4)

    # (1, Bp) lane-dense kernel output -> (B, 1) like the PyTorch module.
    return out.reshape(Bp, 1)[:B]


def init_params(input_size, key):
    """Deterministic synthetic init (PyTorch-style uniform fan-in scaling)."""
    sizes = [(input_size, 128), (128, 64), (64, 32), (32, 1)]
    params = {}
    for idx, (fan_in, fan_out) in enumerate(sizes, start=1):
        key, kw, kb = jax.random.split(key, 3)
        bound = 1.0 / (fan_in ** 0.5)
        params[f"w{idx}"] = jax.random.uniform(
            kw, (fan_in, fan_out), jnp.float32, -bound, bound)
        params[f"b{idx}"] = jax.random.uniform(
            kb, (1, fan_out), jnp.float32, -bound, bound)
    return params


def ref_forward(x, params):
    hp = jax.lax.Precision.HIGHEST
    h = jnp.maximum(jnp.dot(x, params["w1"], precision=hp) + params["b1"], 0.0)
    h = jnp.maximum(jnp.dot(h, params["w2"], precision=hp) + params["b2"], 0.0)
    h = jnp.maximum(jnp.dot(h, params["w3"], precision=hp) + params["b3"], 0.0)
    z = jnp.dot(h, params["w4"], precision=hp) + params["b4"]
    return jax.nn.sigmoid(z)


if __name__ == "__main__":
    input_size = 32
    batch = 300          # non-multiple of the tile -> exercises padding path

    key = jax.random.PRNGKey(0)
    key, kx = jax.random.split(key)
    x = jax.random.normal(kx, (batch, input_size), jnp.float32)
    params = init_params(input_size, key)

    ref = ref_forward(x, params)

    # f32 matmul path (tight tolerance).
    out_f32 = jax.block_until_ready(
        mymodel_forward(x, params, batch_tile=256, matmul_dtype=jnp.float32))
    assert out_f32.shape == (batch, 1)
    assert jnp.allclose(out_f32, ref, atol=1e-4, rtol=1e-4), \
        float(jnp.max(jnp.abs(out_f32 - ref)))

    # bf16 matmul operands (MXU fast path on v6e/v7x), f32 accumulate.
    out_bf16 = jax.block_until_ready(
        mymodel_forward(x, params, batch_tile=256, matmul_dtype=jnp.bfloat16))
    assert out_bf16.shape == (batch, 1)
    assert jnp.allclose(out_bf16, ref, atol=3e-2, rtol=3e-2), \
        float(jnp.max(jnp.abs(out_bf16 - ref)))

    print("KERNEL_OK")
</pallas_src>

<mosaic_0001>
module attributes {stable_mosaic.version = 11 : i64} {
  func.func @mlp_kernel(%arg0: i32, %arg1: memref<256x32xf32, #tpu.memory_space<vmem>>, %arg2: memref<32x128xf32, #tpu.memory_space<vmem>>, %arg3: memref<1x128xf32, #tpu.memory_space<vmem>>, %arg4: memref<128x64xf32, #tpu.memory_space<vmem>>, %arg5: memref<1x64xf32, #tpu.memory_space<vmem>>, %arg6: memref<64x32xf32, #tpu.memory_space<vmem>>, %arg7: memref<1x32xf32, #tpu.memory_space<vmem>>, %arg8: memref<1x32xf32, #tpu.memory_space<vmem>>, %arg9: memref<1x1xf32, #tpu.memory_space<smem>>, %arg10: memref<1x256xf32, #tpu.memory_space<vmem>>) attributes {dimension_semantics = [#tpu.dimension_semantics<parallel>], iteration_bounds = array<i64: 2>, scalar_prefetch = 0 : i64, scratch_operands = 0 : i64, tpu.core_type = #tpu.core_type<tc>, window_params = [{transform_indices = @transform_0, window_bounds = array<i64: 256, 32>}, {pipeline_mode = #tpu.pipeline_mode<synchronous>, transform_indices = @transform_1, window_bounds = array<i64: 32, 128>}, {pipeline_mode = #tpu.pipeline_mode<synchronous>, transform_indices = @transform_2, window_bounds = array<i64: 1, 128>}, {pipeline_mode = #tpu.pipeline_mode<synchronous>, transform_indices = @transform_3, window_bounds = array<i64: 128, 64>}, {pipeline_mode = #tpu.pipeline_mode<synchronous>, transform_indices = @transform_4, window_bounds = array<i64: 1, 64>}, {pipeline_mode = #tpu.pipeline_mode<synchronous>, transform_indices = @transform_5, window_bounds = array<i64: 64, 32>}, {pipeline_mode = #tpu.pipeline_mode<synchronous>, transform_indices = @transform_6, window_bounds = array<i64: 1, 32>}, {pipeline_mode = #tpu.pipeline_mode<synchronous>, transform_indices = @transform_7, window_bounds = array<i64: 1, 32>}, {transform_indices = @transform_8, window_bounds = array<i64: 1, 1>}, {transform_indices = @transform_9, window_bounds = array<i64: 1, 256>}]} {
    %c0 = arith.constant 0 : index
    %c0_0 = arith.constant 0 : index
    %0 = vector.load %arg1[%c0, %c0_0] : memref<256x32xf32, #tpu.memory_space<vmem>>, vector<256x32xf32>
    %c0_1 = arith.constant 0 : index
    %c0_2 = arith.constant 0 : index
    %1 = vector.load %arg2[%c0_1, %c0_2] : memref<32x128xf32, #tpu.memory_space<vmem>>, vector<32x128xf32>
    %cst = arith.constant dense<0.000000e+00> : vector<256x128xf32>
    %2 = tpu.matmul %0, %1, %cst {dimension_numbers = #tpu.dot_dimension_numbers<[1], [0], [0], [1], [0, 0, 1, 1], [], []>} : vector<256x32xf32>, vector<32x128xf32>, vector<256x128xf32> -> vector<256x128xf32>
    %c0_3 = arith.constant 0 : index
    %c0_4 = arith.constant 0 : index
    %3 = vector.load %arg3[%c0_3, %c0_4] : memref<1x128xf32, #tpu.memory_space<vmem>>, vector<1x128xf32>
    %4 = vector.broadcast %3 : vector<1x128xf32> to vector<256x128xf32>
    %5 = arith.addf %2, %4 : vector<256x128xf32>
    %cst_5 = arith.constant 0.000000e+00 : f32
    %6 = vector.broadcast %cst_5 : f32 to vector<256x128xf32>
    %7 = arith.maximumf %5, %6 : vector<256x128xf32>
    %c0_6 = arith.constant 0 : index
    %c0_7 = arith.constant 0 : index
    %8 = vector.load %arg4[%c0_6, %c0_7] : memref<128x64xf32, #tpu.memory_space<vmem>>, vector<128x64xf32>
    %cst_8 = arith.constant dense<0.000000e+00> : vector<256x64xf32>
    %9 = tpu.matmul %7, %8, %cst_8 {dimension_numbers = #tpu.dot_dimension_numbers<[1], [0], [0], [1], [0, 0, 1, 1], [], []>} : vector<256x128xf32>, vector<128x64xf32>, vector<256x64xf32> -> vector<256x64xf32>
    %c0_9 = arith.constant 0 : index
    %c0_10 = arith.constant 0 : index
    %10 = vector.load %arg5[%c0_9, %c0_10] : memref<1x64xf32, #tpu.memory_space<vmem>>, vector<1x64xf32>
    %11 = vector.broadcast %10 : vector<1x64xf32> to vector<256x64xf32>
    %12 = arith.addf %9, %11 : vector<256x64xf32>
    %cst_11 = arith.constant 0.000000e+00 : f32
    %13 = vector.broadcast %cst_11 : f32 to vector<256x64xf32>
    %14 = arith.maximumf %12, %13 : vector<256x64xf32>
    %c0_12 = arith.constant 0 : index
    %c0_13 = arith.constant 0 : index
    %15 = vector.load %arg6[%c0_12, %c0_13] : memref<64x32xf32, #tpu.memory_space<vmem>>, vector<64x32xf32>
    %cst_14 = arith.constant dense<0.000000e+00> : vector<256x32xf32>
    %16 = tpu.matmul %14, %15, %cst_14 {dimension_numbers = #tpu.dot_dimension_numbers<[1], [0], [0], [1], [0, 0, 1, 1], [], []>} : vector<256x64xf32>, vector<64x32xf32>, vector<256x32xf32> -> vector<256x32xf32>
    %c0_15 = arith.constant 0 : index
    %c0_16 = arith.constant 0 : index
    %17 = vector.load %arg7[%c0_15, %c0_16] : memref<1x32xf32, #tpu.memory_space<vmem>>, vector<1x32xf32>
    %18 = vector.broadcast %17 : vector<1x32xf32> to vector<256x32xf32>
    %19 = arith.addf %16, %18 : vector<256x32xf32>
    %cst_17 = arith.constant 0.000000e+00 : f32
    %20 = vector.broadcast %cst_17 : f32 to vector<256x32xf32>
    %21 = arith.maximumf %19, %20 : vector<256x32xf32>
    %c0_18 = arith.constant 0 : index
    %c0_19 = arith.constant 0 : index
    %22 = vector.load %arg8[%c0_18, %c0_19] : memref<1x32xf32, #tpu.memory_space<vmem>>, vector<1x32xf32>
    %23 = vector.broadcast %22 : vector<1x32xf32> to vector<256x32xf32>
    %24 = arith.mulf %21, %23 : vector<256x32xf32>
    %cst_20 = arith.constant dense<0.000000e+00> : vector<256xf32>
    %25 = vector.multi_reduction <add>, %24, %cst_20 [1] : vector<256x32xf32> to vector<256xf32>
    %c0_21 = arith.constant 0 : index
    %c0_22 = arith.constant 0 : index
    %26 = memref.load %arg9[%c0_21, %c0_22] : memref<1x1xf32, #tpu.memory_space<smem>>
    %27 = vector.broadcast %26 : f32 to vector<256xf32>
    %28 = arith.addf %25, %27 : vector<256xf32>
    %29 = arith.negf %28 : vector<256xf32>
    %30 = math.exp %29 : vector<256xf32>
    %cst_23 = arith.constant 1.000000e+00 : f32
    %31 = vector.broadcast %cst_23 : f32 to vector<256xf32>
    %32 = arith.addf %31, %30 : vector<256xf32>
    %33 = arith.divf %31, %32 : vector<256xf32>
    %34 = vector.shape_cast %33 : vector<256xf32> to vector<1x256xf32>
    %c0_24 = arith.constant 0 : index
    %c0_25 = arith.constant 0 : index
    %35 = vector.load %arg10[%c0_24, %c0_25] : memref<1x256xf32, #tpu.memory_space<vmem>>, vector<1x256xf32>
    tpu.vector_store %arg10[%c0_24, %c0_25], %34 {strides = array<i32>} : memref<1x256xf32, #tpu.memory_space<vmem>>, vector<1x256xf32>,
    return
  }
  func.func @transform_0(%arg0: i32) -> (i32, i32) {
    %c0_i32 = arith.constant 0 : i32
    %c0_i32_0 = arith.constant 0 : i32
    return %arg0, %c0_i32 : i32, i32
  }
  func.func @transform_1(%arg0: i32) -> (i32, i32) {
    %c0_i32 = arith.constant 0 : i32
    %c0_i32_0 = arith.constant 0 : i32
    %c0_i32_1 = arith.constant 0 : i32
    return %c0_i32, %c0_i32_0 : i32, i32
  }
  func.func @transform_2(%arg0: i32) -> (i32, i32) {
    %c0_i32 = arith.constant 0 : i32
    %c0_i32_0 = arith.constant 0 : i32
    %c0_i32_1 = arith.constant 0 : i32
    return %c0_i32, %c0_i32_0 : i32, i32
  }
  func.func @transform_3(%arg0: i32) -> (i32, i32) {
    %c0_i32 = arith.constant 0 : i32
    %c0_i32_0 = arith.constant 0 : i32
    %c0_i32_1 = arith.constant 0 : i32
    return %c0_i32, %c0_i32_0 : i32, i32
  }
  func.func @transform_4(%arg0: i32) -> (i32, i32) {
    %c0_i32 = arith.constant 0 : i32
    %c0_i32_0 = arith.constant 0 : i32
    %c0_i32_1 = arith.constant 0 : i32
    return %c0_i32, %c0_i32_0 : i32, i32
  }
  func.func @transform_5(%arg0: i32) -> (i32, i32) {
    %c0_i32 = arith.constant 0 : i32
    %c0_i32_0 = arith.constant 0 : i32
    %c0_i32_1 = arith.constant 0 : i32
    return %c0_i32, %c0_i32_0 : i32, i32
  }
  func.func @transform_6(%arg0: i32) -> (i32, i32) {
    %c0_i32 = arith.constant 0 : i32
    %c0_i32_0 = arith.constant 0 : i32
    %c0_i32_1 = arith.constant 0 : i32
    return %c0_i32, %c0_i32_0 : i32, i32
  }
  func.func @transform_7(%arg0: i32) -> (i32, i32) {
    %c0_i32 = arith.constant 0 : i32
    %c0_i32_0 = arith.constant 0 : i32
    %c0_i32_1 = arith.constant 0 : i32
    return %c0_i32, %c0_i32_0 : i32, i32
  }
  func.func @transform_8(%arg0: i32) -> (i32, i32) {
    %c0_i32 = arith.constant 0 : i32
    %c0_i32_0 = arith.constant 0 : i32
    %c0_i32_1 = arith.constant 0 : i32
    return %c0_i32, %c0_i32_0 : i32, i32
  }
  func.func @transform_9(%arg0: i32) -> (i32, i32) {
    %c0_i32 = arith.constant 0 : i32
    %c0_i32_0 = arith.constant 0 : i32
    return %c0_i32, %arg0 : i32, i32
  }
}

</mosaic_0001>

<bundles_post_ra>
// kernel: tpu_custom_call.1
= control target key start
LH: loop header
LB: loop body
LE: loop exit
PB: predicated region body
PF: predicated region fallthrough
CT: control target
= control target key end

     0   :  { %s6923_s0 = inlined_call_operand.vmem [shape: f32[512,32], index: 0, kind: input, shape index: {}]   ;;  %s6924_s1 = inlined_call_operand.vmem [shape: f32[32,128], index: 1, kind: input, shape index: {}]   ;;  %s6925_s2 = inlined_call_operand.vmem [shape: f32[1,128], index: 2, kind: input, shape index: {}]   ;;  %s6926_s3 = inlined_call_operand.vmem [shape: f32[128,64], index: 3, kind: input, shape index: {}]   ;;  %s6927_s4 = inlined_call_operand.vmem [shape: f32[1,64], index: 4, kind: input, shape index: {}]   ;;  %s6928_s5 = inlined_call_operand.vmem [shape: f32[64,32], index: 5, kind: input, shape index: {}]   ;;  %s6929_s6 = inlined_call_operand.vmem [shape: f32[1,32], index: 6, kind: input, shape index: {}]   ;;  %s6930_s7 = inlined_call_operand.vmem [shape: f32[1,32], index: 7, kind: input, shape index: {}]   ;;  %s6931_s8 = inlined_call_operand.<no memory space> [shape: f32[1,1], index: 8, kind: input, shape index: {}]   ;;  %s6932_s9 = inlined_call_operand.hbm [shape: f32[1,512], index: 9, kind: output, shape index: {}]  }
   0x1   :  { %14 = sst [smem:[#allocation2]] %s6931_s8 }
   0x2   :  { %15 = vsyncpa [#allocation4], 0 }
   0x3   :  { %17 = vsyncpa [#allocation4 + $0x1], 0  ;;  %s5535_s11 = smov 0   ;;  %s5537_s12 = smov 0  }
   0x4   :  { %s5539_s13 = smov 0   ;;  %s5541_s14 = smov 0  }
   0x5 LB: > { %s4746_s8 = sadd.s32 4294967295, %s5477_s14   ;;  %s4747_s15 = sadd.s32 4294967294, %s5477_s14   ;;  %s5477_s14 = sphi %s5541_s14, %s6938_s14   ;;  %s5473_s13 = sphi %s5539_s13, %s6937_s13   ;;  %s5469_s12 = sphi %s5537_s12, %s6936_s12   ;;  %s5465_s11 = sphi %s5535_s11, %s6935_s11  }
   0x6   : > { %s5558_s16 = sadd.s32 1, %s5477_s14   ;;  %s224_s17 = sadd.s32 1, %s5473_s13 }
   0x7   : > { %s221_s18 = ssub.s32 %s5477_s14, %s5558_s16  ;;  %p234_p0 = scmp.ne.s32.totalorder %s5473_s13, %s5469_s12 }
   0x8   : > { %p222_p1 = scmp.eq.s32.totalorder %s221_s18, 0  ;;  %p235_p2 = scmp.eq.s32.totalorder %s4746_s8, 1 }
   0x9   : > { %p240_p3 = scmp.ne.s32.totalorder %s5469_s12, %s5465_s11  ;;  %p241_p4 = scmp.eq.s32.totalorder %s4747_s15, 1 }
   0xa   : > { %s5568_s19 = scalar_select %p222_p1, %s5473_s13, %s224_s17  }
   0xb   : > { %p5570_p5 = por %p235_p2, %p234_p0  ;;  %p5574_p6 = por %p241_p4, %p240_p3 }
   0xc   : > { %p4750_p7 = scmp.ge.s32.totalorder %s5477_s14, 1  ;;  %p292_p8 = scmp.lt.s32.totalorder %s5477_s14, 3 }
   0xe   : > { %p293_p9 = pnand %p4750_p7, %p292_p8 }
   0xf   : > { %v367_v0 = vld [vmem:[%s6924_s1] sm:$0xff] (!%p293_p9)  ;;  %v368_v1 = vld [vmem:[%s6924_s1 + $0x8] sm:$0xff] (!%p293_p9)  ;;  %v369_v2 = vld [vmem:[%s6924_s1 + $0x10] sm:$0xff] (!%p293_p9)  ;;  %s5589_s28 = sshll.u32 (!%p293_p9), %s4746_s8, 5  ;;  %vm378_vm0 = vcmask (!%p293_p9), 261120   ;;  %vm1027_vm1 = vcmask (!%p293_p9), 523264  }
  0x10   : > { %296 = sbr.rel (%p293_p9) target bundleno = 1211 (0x4bb), region = 56  ;;  %v5184_v3 = vpack.c.bf16 (!%p293_p9), %v368_v1, %v367_v0  ;;  %v370_v4 = vld [vmem:[%s6924_s1 + $0x18] sm:$0xff] (!%p293_p9)  ;;  %p329_p10 = scmp.lt.s32.totalorder (!%p293_p9), %s5589_s28, 63  ;;  %v732_v6 = vld [vmem:[%s6926_s3] sm:$0xff] (!%p293_p9)  ;;  %v733_v7 = vld [vmem:[%s6926_s3 + $0x8] sm:$0xff] (!%p293_p9)  ;;  %vm4473_vm2 = vcmask (!%p293_p9), 130112  }
  0x11   : > { %v5188_v5 = vpack.c.bf16 (!%p293_p9), %v370_v4, %v369_v2  ;;  %v5192_v8 = vpack.c.bf16 (!%p293_p9), %v733_v7, %v732_v6  ;;  %v734_v12 = vld [vmem:[%s6926_s3 + $0x10] sm:$0xff] (!%p293_p9)  ;;  %v735_v13 = vld [vmem:[%s6926_s3 + $0x18] sm:$0xff] (!%p293_p9)  ;;  %v736_v20 = vld [vmem:[%s6926_s3 + $0x20] sm:$0xff] (!%p293_p9)  ;;  %s1516_s29 = sld [smem:[#allocation2]] (!%p293_p9)  ;;  %vm4480_vm3 = vcmask (!%p293_p9), 195712   ;;  %vm4487_vm4 = vcmask (!%p293_p9), 261312   ;;  %s6881_s22 = scalar_lea.hbm (!%p293_p9), %s6932_s9, %s5589_s28 }
  0x12   : > { %5185 = vmatprep.subr.bf16.mxu0 (!%p293_p9), %v5184_v3  ;;  %5240 = vmatprep.subr.bf16.mxu1 (!%p293_p9), %v5184_v3  ;;  %v5196_v19 = vpack.c.bf16 (!%p293_p9), %v735_v13, %v734_v12  ;;  %v737_v21 = vld [vmem:[%s6926_s3 + $0x28] sm:$0xff] (!%p293_p9)  ;;  %v738_v27 = vld [vmem:[%s6926_s3 + $0x30] sm:$0xff] (!%p293_p9)  ;;  %v739_v28 = vld [vmem:[%s6926_s3 + $0x38] sm:$0xff] (!%p293_p9)  ;;  %vm4494_vm5 = vcmask (!%p293_p9), 326912   ;;  %vm4501_vm6 = vcmask (!%p293_p9), 392512   ;;  %vm4508_vm7 = vcmask (!%p293_p9), 458112  }
  0x13   : > { %5187 = vmatpush3.bf16.msra.mxu0 (!%p293_p9), %v5184_v3  ;;  %5242 = vmatpush3.bf16.msra.mxu1 (!%p293_p9), %v5184_v3  ;;  %v5200_v26 = vpack.c.bf16 (!%p293_p9), %v737_v21, %v736_v20  ;;  %v5204_v33 = vpack.c.bf16 (!%p293_p9), %v739_v28, %v738_v27  ;;  %v740_v34 = vld [vmem:[%s6926_s3 + $0x40] sm:$0xff] (!%p293_p9)  ;;  %v741_v35 = vld [vmem:[%s6926_s3 + $0x48] sm:$0xff] (!%p293_p9)  ;;  %v742_v41 = vld [vmem:[%s6926_s3 + $0x50] sm:$0xff] (!%p293_p9)  ;;  %vm4515_vm8 = vcmask (!%p293_p9), 523712   ;;  %vm4522_vm9 = vcmask (!%p293_p9), 589312   ;;  %s325_s30 = sand.u32 (!%p293_p9), 1, %s5469_s12  }
  0x14   : > { %5189 = vmatprep.subr.bf16.mxu0 (!%p293_p9), %v5188_v5  ;;  %5241 = vmatprep.subr.bf16.mxu1 (!%p293_p9), %v5188_v5  ;;  %v5208_v40 = vpack.c.bf16 (!%p293_p9), %v741_v35, %v740_v34  ;;  %v743_v42 = vld [vmem:[%s6926_s3 + $0x58] sm:$0xff] (!%p293_p9)  ;;  %v744_v48 = vld [vmem:[%s6926_s3 + $0x60] sm:$0xff] (!%p293_p9)  ;;  %v745_v49 = vld [vmem:[%s6926_s3 + $0x68] sm:$0xff] (!%p293_p9)  ;;  %vm4529_vm10 = vcmask (!%p293_p9), 654912   ;;  %vm4536_vm11 = vcmask (!%p293_p9), 720512   ;;  %vm4543_vm12 = vcmask (!%p293_p9), 786112  }
  0x15   : > { %v5212_v47 = vpack.c.bf16 (!%p293_p9), %v743_v42, %v742_v41  ;;  %v5216_v54 = vpack.c.bf16 (!%p293_p9), %v745_v49, %v744_v48  ;;  %v746_v59 = vld [vmem:[%s6926_s3 + $0x70] sm:$0xff] (!%p293_p9)  ;;  %v747_v60 = vld [vmem:[%s6926_s3 + $0x78] sm:$0xff] (!%p293_p9)  ;;  %v1012_v62 = vld [vmem:[%s6928_s5] sm:$0xff] (!%p293_p9)  ;;  %vm4550_vm13 = vcmask (!%p293_p9), 851712   ;;  %vm4557_vm14 = vcmask (!%p293_p9), 917312   ;;  %s5481_s24 = smov (!%p293_p9), [#allocation3]  }
  0x16   : > { %v5220_v61 = vpack.c.bf16 (!%p293_p9), %v747_v60, %v746_v59  ;;  %v1013_v63 = vld [vmem:[%s6928_s5 + $0x8] sm:$0xff] (!%p293_p9)  ;;  %v1014_v0 = vld [vmem:[%s6928_s5 + $0x10] sm:$0xff] (!%p293_p9)  ;;  %v1015_v2 = vld [vmem:[%s6928_s5 + $0x18] sm:$0xff] (!%p293_p9)  ;;  %vm4564_vm15 = vcmask (!%p293_p9), 982912   ;;  %s5419_s26 = sshll.u32 (!%p293_p9), %s5481_s24, 4  ;;  %s5420_s26 = int_to_ptr.vmem [resolvable:$false] %s5419_s26 }
  0x17   : > { %s330_s10 = scalar_select %p329_p10, %s5589_s28, 63  ;;  %5191 = vmatpush3.bf16.msra.mxu0 %v5188_v5  ;;  %5243 = vmatpush3.bf16.msra.mxu1 %v5188_v5  ;;  %v5224_v1 = vpack.c.bf16 %v1013_v63, %v1012_v62  ;;  %v5228_v3 = vpack.c.bf16 %v1015_v2, %v1014_v0  ;;  %v1016_v4 = vld [vmem:[%s6928_s5 + $0x20] sm:$0xff]  ;;  %v1017_v5 = vld [vmem:[%s6928_s5 + $0x28] sm:$0xff]  ;;  %v1018_v7 = vld [vmem:[%s6928_s5 + $0x30] sm:$0xff] }
  0x18   : > { %5193 = vmatprep.subr.bf16.mxu1 %v5192_v8  ;;  %v5232_v6 = vpack.c.bf16 %v1017_v5, %v1016_v4  ;;  %s5421_s27 = scalar_lea.vmem %s5420_s26, 64 }
  0x19   : > { %s4753_s8 = sshll.u32 %s330_s10, 3  ;;  %5225 = vmatprep.subr.bf16.mxu0 %v5224_v1  ;;  %s4751_s10 = sshll.u32 %s325_s30, 1 }
  0x1a   : > { %s5605_s25 = scalar_lea.vmem %s6923_s0, %s4753_s8  ;;  %s327_s15 = scalar_lea.vmem [#allocation3], %s4751_s10 }
  0x1b   : > { %v335_v9 = vld [vmem:[%s5605_s25] sm:$0xff]  ;;  %v336_v10 = vld [vmem:[%s5605_s25 + $0x8] sm:$0xff]  ;;  %v337_v11 = vld [vmem:[%s5605_s25 + $0x10] sm:$0xff]  ;;  %s4688_s17 = sshll.u32 %s327_s15, 4  ;;  %s4674_s8 = scalar_lea.sflag [#allocation4], %s325_s30  ;;  %s6883_s17 = int_to_ptr.vmem [resolvable:$true] %s4688_s17 }
  0x1c   : > { %4992 = vmatprep.mubr.msk.f32.mxu0 %vm378_vm0, %v335_v9  ;;  %v338_v14 = vld [vmem:[%s5605_s25 + $0x18] sm:$0xff]  ;;  %v351_v15 = vld [vmem:[%s5605_s25 + $0x80] sm:$0xff]  ;;  %v352_v16 = vld [vmem:[%s5605_s25 + $0x88] sm:$0xff]  ;;  %s5415_s23 = scalar_lea.vmem %s6883_s17, 32  ;;  %p5422_p0 = scmp.lt.s32.totalorder %s6883_s17, %s5420_s26 }
  0x1d   : > { %4993 = vmatmul.mubr.msk.f32.vlgmr.msra.gmra.mrb[0].mxu0 %vm378_vm0, %v336_v10  ;;  %v339_v17 = vld [vmem:[%s5605_s25 + $0x20] sm:$0xff]  ;;  %5016 = vmatprep.mubr.msk.f32.mxu1 %vm378_vm0, %v351_v15  ;;  %v353_v18 = vld [vmem:[%s5605_s25 + $0x90] sm:$0xff]  ;;  %v354_v22 = vld [vmem:[%s5605_s25 + $0x98] sm:$0xff]  ;;  %p5416_p11 = scmp.ne.s32.totalorder %s6883_s17, %s5415_s23  ;;  %p5423_p1 = scmp.lt.s32.totalorder %s5421_s27, %s5415_s23 }
  0x1e   : > { %4995 = vmatprep.mubr.msk.f32.mxu0 %vm378_vm0, %v337_v11  ;;  %5017 = vmatmul.mubr.msk.f32.vlgmr.msra.gmra.mrb[0].mxu1 %vm378_vm0, %v352_v16  ;;  %v340_v23 = vld [vmem:[%s5605_s25 + $0x28] sm:$0xff]  ;;  %v355_v24 = vld [vmem:[%s5605_s25 + $0xa0] sm:$0xff]  ;;  %v341_v25 = vld [vmem:[%s5605_s25 + $0x30] sm:$0xff] }
  0x1f   : > { %5019 = vmatprep.mubr.msk.f32.mxu1 %vm378_vm0, %v353_v18  ;;  %5195 = vmatpush3.bf16.msra.mxu1 %v5192_v8  ;;  %v356_v29 = vld [vmem:[%s5605_s25 + $0xa8] sm:$0xff]  ;;  %v342_v30 = vld [vmem:[%s5605_s25 + $0x38] sm:$0xff]  ;;  %v357_v31 = vld [vmem:[%s5605_s25 + $0xb0] sm:$0xff]  ;;  %p5417_p12 = pnand %p5416_p11, %p5570_p5  ;;  %p5424_p2 = por %p5423_p1, %p5422_p0 }
  0x20   : > { %5197 = vmatprep.subr.bf16.mxu1 %v5196_v19  ;;  %v343_v32 = vld [vmem:[%s5605_s25 + $0x40] sm:$0xff]  ;;  %v358_v36 = vld [vmem:[%s5605_s25 + $0xb8] sm:$0xff]  ;;  %v344_v37 = vld [vmem:[%s5605_s25 + $0x48] sm:$0xff]  ;;  %5227 = vmatpush3.bf16.msra.mxu0 %v5224_v1 }
  0x21   : > { %4996 = vmatmul.mubr.msk.f32.gmra.mrb[2].mxu0 %vm378_vm0, %v338_v14  ;;  %v359_v38 = vld [vmem:[%s5605_s25 + $0xc0] sm:$0xff]  ;;  %v345_v39 = vld [vmem:[%s5605_s25 + $0x50] sm:$0xff]  ;;  %v360_v43 = vld [vmem:[%s5605_s25 + $0xc8] sm:$0xff]  ;;  %5229 = vmatprep.subr.bf16.mxu0 %v5228_v3  ;;  %p5418_p13 = pneg %p5417_p12 }
  0x22   : > { %4998 = vmatprep.mubr.msk.f32.mxu0 %vm378_vm0, %v339_v17  ;;  %5020 = vmatmul.mubr.msk.f32.gmra.mrb[2].mxu1 %vm378_vm0, %v354_v22  ;;  %v346_v44 = vld [vmem:[%s5605_s25 + $0x58] sm:$0xff]  ;;  %v361_v45 = vld [vmem:[%s5605_s25 + $0xd0] sm:$0xff]  ;;  %v347_v46 = vld [vmem:[%s5605_s25 + $0x60] sm:$0xff] }
  0x23   : > { %5022 = vmatprep.mubr.msk.f32.mxu1 %vm378_vm0, %v355_v24  ;;  %5199 = vmatpush3.bf16.msra.mxu1 %v5196_v19  ;;  %v362_v50 = vld [vmem:[%s5605_s25 + $0xd8] sm:$0xff]  ;;  %v348_v51 = vld [vmem:[%s5605_s25 + $0x68] sm:$0xff]  ;;  %v363_v52 = vld [vmem:[%s5605_s25 + $0xe0] sm:$0xff]  ;;  %p5425_p3 = pnand %p5424_p2, %p5418_p13 }
  0x24   : > { %5201 = vmatprep.subr.bf16.mxu1 %v5200_v26  ;;  %v349_v53 = vld [vmem:[%s5605_s25 + $0x70] sm:$0xff]  ;;  %v364_v55 = vld [vmem:[%s5605_s25 + $0xe8] sm:$0xff]  ;;  %v350_v56 = vld [vmem:[%s5605_s25 + $0x78] sm:$0xff]  ;;  %5231 = vmatpush3.bf16.msra.mxu0 %v5228_v3 }
  0x25   : > { %4999 = vmatmul.mubr.msk.f32.gmra.mrb[4].mxu0 %vm378_vm0, %v340_v23  ;;  %v365_v57 = vld [vmem:[%s5605_s25 + $0xf0] sm:$0xff]  ;;  %v366_v58 = vld [vmem:[%s5605_s25 + $0xf8] sm:$0xff]  ;;  %5233 = vmatprep.subr.bf16.mxu0 %v5232_v6  ;;  %v5740_v10 = vld [vmem:[%s6925_s2] ss:$0 sm:$0xff] }
  0x26   : > { %5001 = vmatprep.mubr.msk.f32.mxu0 %vm378_vm0, %v341_v25  ;;  %5023 = vmatmul.mubr.msk.f32.gmra.mrb[4].mxu1 %vm378_vm0, %v356_v29  ;;  %v1019_v8 = vld [vmem:[%s6928_s5 + $0x38] sm:$0xff] }
  0x27   : > { %5025 = vmatprep.mubr.msk.f32.mxu1 %vm378_vm0, %v357_v31  ;;  %5203 = vmatpush3.bf16.msra.mxu1 %v5200_v26  ;;  %v5236_v9 = vpack.c.bf16 %v1019_v8, %v1018_v7 }
  0x28   : > { %5205 = vmatprep.subr.bf16.mxu1 %v5204_v33  ;;  %5235 = vmatpush3.bf16.msra.mxu0 %v5232_v6 }
  0x29   : > { %5002 = vmatmul.mubr.msk.f32.gmra.mrb[6].mxu0 %vm378_vm0, %v342_v30  ;;  %5237 = vmatprep.subr.bf16.mxu0 %v5236_v9 }
  0x2a   : > { %5004 = vmatprep.mubr.msk.f32.mxu0 %vm378_vm0, %v343_v32  ;;  %5026 = vmatmul.mubr.msk.f32.gmra.mrb[6].mxu1 %vm378_vm0, %v358_v36 }
  0x2b   : > { %5028 = vmatprep.mubr.msk.f32.mxu1 %vm378_vm0, %v359_v38  ;;  %5207 = vmatpush3.bf16.msra.mxu1 %v5204_v33 }
  0x2c   : > { %5209 = vmatprep.subr.bf16.mxu1 %v5208_v40  ;;  %5239 = vmatpush3.bf16.msra.mxu0 %v5236_v9 }
  0x2d   : > { %5005 = vmatmul.mubr.msk.f32.gmra.mrb[8].mxu0 %vm378_vm0, %v344_v37 }
  0x2e   : > { %5007 = vmatprep.mubr.msk.f32.mxu0 %vm378_vm0, %v345_v39  ;;  %5029 = vmatmul.mubr.msk.f32.gmra.mrb[8].mxu1 %vm378_vm0, %v360_v43 }
  0x2f   : > { %5031 = vmatprep.mubr.msk.f32.mxu1 %vm378_vm0, %v361_v45  ;;  %5211 = vmatpush3.bf16.msra.mxu1 %v5208_v40 }
  0x30   : > { %5213 = vmatprep.subr.bf16.mxu1 %v5212_v47 }
  0x31   : > { %5008 = vmatmul.mubr.msk.f32.gmra.mrb[10].mxu0 %vm378_vm0, %v346_v44 }
  0x32   : > { %5010 = vmatprep.mubr.msk.f32.mxu0 %vm378_vm0, %v347_v46  ;;  %5032 = vmatmul.mubr.msk.f32.gmra.mrb[10].mxu1 %vm378_vm0, %v362_v50 }
  0x33   : > { %5034 = vmatprep.mubr.msk.f32.mxu1 %vm378_vm0, %v363_v52  ;;  %5215 = vmatpush3.bf16.msra.mxu1 %v5212_v47 }
  0x34   : > { %5217 = vmatprep.subr.bf16.mxu1 %v5216_v54 }
  0x35   : > { %5011 = vmatmul.mubr.msk.f32.gmra.mrb[12].mxu0 %vm378_vm0, %v348_v51 }
  0x36   : > { %5013 = vmatprep.mubr.msk.f32.mxu0 %vm378_vm0, %v349_v53  ;;  %5035 = vmatmul.mubr.msk.f32.gmra.mrb[12].mxu1 %vm378_vm0, %v364_v55 }
  0x37   : > { %5037 = vmatprep.mubr.msk.f32.mxu1 %vm378_vm0, %v365_v57  ;;  %5219 = vmatpush3.bf16.msra.mxu1 %v5216_v54 }
  0x38   : > { %5221 = vmatprep.subr.bf16.mxu1 %v5220_v61 }
  0x39   : > { %5014 = vmatmul.mubr.msk.f32.gmra.mrb[14].mxu0 %vm378_vm0, %v350_v56 }
  0x3a   : > { %5038 = vmatmul.mubr.msk.f32.gmra.mrb[14].mxu1 %vm378_vm0, %v366_v58 }
  0x3b   : > { %5223 = vmatpush3.bf16.msra.mxu1 %v5220_v61 }
  0xf0   : > { %v4994_v11 = vpop.f32.mrb[0].mxu0 }
  0xf1   : > { %v547_v12 = vadd.f32 %v4994_v11, %v5740_v10  ;;  %v541_v13 = vpop.f32.mrb[1].mxu0  ;;  %v5744_v15 = vpop.f32.mrb[0].mxu1 }
  0xf2   : > { %v542_v14 = vadd.f32 %v5740_v10, %v541_v13  ;;  %v621_v18 = vpop.f32.mrb[1].mxu1 }
  0xf3   : > { %v701_v19 = vmax.f32 %v547_v12, 0.0  ;;  %v622_v2 = vadd.f32 %v5740_v10, %v621_v18 }
  0xf4   : > { %v700_v16 = vmax.f32 %v542_v14, 0.0  ;;  %v4997_v17 = vpop.f32.mrb[2].mxu0 }
  0xf5   : > { %v557_v20 = vadd.f32 %v4997_v17, %v5740_v10  ;;  %v551_v21 = vpop.f32.mrb[3].mxu0  ;;  %v5748_v23 = vpop.f32.mrb[2].mxu1  ;;  %v716_v11 = vmax.f32 %v622_v2, 0.0 }
  0xf6   : > { %v552_v22 = vadd.f32 %v5740_v10, %v551_v21  ;;  %5072 = vmatprep.mubr.f32.mxu1 %v700_v16  ;;  %v631_v26 = vpop.f32.mrb[3].mxu1  ;;  %v627_v16 = vadd.f32 %v5744_v15, %v5740_v10 }
  0xf7   : > { %5073 = vmatmul.mubr.f32.vlgmr.msra.gmra.mrb[16].mxu1 %v701_v19  ;;  %v703_v27 = vmax.f32 %v557_v20, 0.0  ;;  %v632_v12 = vadd.f32 %v5740_v10, %v631_v26  ;;  %v637_v20 = vadd.f32 %v5748_v23, %v5740_v10 }
  0xf8   : > { %v702_v24 = vmax.f32 %v552_v22, 0.0  ;;  %v5000_v25 = vpop.f32.mrb[4].mxu0  ;;  %v717_v19 = vmax.f32 %v627_v16, 0.0 }
  0xf9   : > { %v567_v28 = vadd.f32 %v5000_v25, %v5740_v10  ;;  %v561_v29 = vpop.f32.mrb[5].mxu0  ;;  %v5752_v31 = vpop.f32.mrb[4].mxu1  ;;  %v718_v17 = vmax.f32 %v632_v12, 0.0  ;;  %v719_v25 = vmax.f32 %v637_v20, 0.0 }
  0xfa   : > { %v562_v30 = vadd.f32 %v5740_v10, %v561_v29  ;;  %5075 = vmatprep.mubr.f32.mxu1 %v702_v24  ;;  %v641_v34 = vpop.f32.mrb[5].mxu1  ;;  %v647_v21 = vadd.f32 %v5752_v31, %v5740_v10 }
  0xfb   : > { %5076 = vmatmul.mubr.f32.gmra.mrb[18].mxu1 %v703_v27  ;;  %v705_v35 = vmax.f32 %v567_v28, 0.0  ;;  %v642_v18 = vadd.f32 %v5740_v10, %v641_v34 }
  0xfc   : > { %v704_v32 = vmax.f32 %v562_v30, 0.0  ;;  %v5003_v33 = vpop.f32.mrb[6].mxu0  ;;  %v721_v15 = vmax.f32 %v647_v21, 0.0 }
  0xfd   : > { %v577_v36 = vadd.f32 %v5003_v33, %v5740_v10  ;;  %v571_v37 = vpop.f32.mrb[7].mxu0  ;;  %v5756_v39 = vpop.f32.mrb[6].mxu1  ;;  %v720_v22 = vmax.f32 %v642_v18, 0.0 }
  0xfe   : > { %v572_v38 = vadd.f32 %v5740_v10, %v571_v37  ;;  %5078 = vmatprep.mubr.f32.mxu1 %v704_v32  ;;  %v651_v42 = vpop.f32.mrb[7].mxu1  ;;  %v657_v26 = vadd.f32 %v5756_v39, %v5740_v10 }
  0xff   : > { %5079 = vmatmul.mubr.f32.gmra.mrb[20].mxu1 %v705_v35  ;;  %v707_v43 = vmax.f32 %v577_v36, 0.0  ;;  %v652_v24 = vadd.f32 %v5740_v10, %v651_v42 }
 0x100   : > { %v706_v40 = vmax.f32 %v572_v38, 0.0  ;;  %v5006_v41 = vpop.f32.mrb[8].mxu0  ;;  %v723_v29 = vmax.f32 %v657_v26, 0.0 }
 0x101   : > { %v587_v44 = vadd.f32 %v5006_v41, %v5740_v10  ;;  %v581_v45 = vpop.f32.mrb[9].mxu0  ;;  %v5030_v47 = vpop.f32.mrb[8].mxu1  ;;  %v722_v27 = vmax.f32 %v652_v24, 0.0 }
 0x102   : > { %v582_v46 = vadd.f32 %v5740_v10, %v581_v45  ;;  %5081 = vmatprep.mubr.f32.mxu1 %v706_v40  ;;  %v661_v50 = vpop.f32.mrb[9].mxu1  ;;  %v667_v23 = vadd.f32 %v5030_v47, %v5740_v10 }
 0x103   : > { %5082 = vmatmul.mubr.f32.gmra.mrb[22].mxu1 %v707_v43  ;;  %v709_v51 = vmax.f32 %v587_v44, 0.0  ;;  %v662_v28 = vadd.f32 %v5740_v10, %v661_v50  ;;  %v5789_v44 = vld [vmem:[%s6927_s4] ss:$0 sm:$0xff] }
 0x104   : > { %v708_v48 = vmax.f32 %v582_v46, 0.0  ;;  %v5009_v49 = vpop.f32.mrb[10].mxu0  ;;  %v725_v32 = vmax.f32 %v667_v23, 0.0 }
 0x105   : > { %v597_v52 = vadd.f32 %v5009_v49, %v5740_v10  ;;  %v591_v53 = vpop.f32.mrb[11].mxu0  ;;  %v5033_v55 = vpop.f32.mrb[10].mxu1  ;;  %v724_v30 = vmax.f32 %v662_v28, 0.0 }
 0x106   : > { %v592_v54 = vadd.f32 %v5740_v10, %v591_v53  ;;  %5084 = vmatprep.mubr.f32.mxu1 %v708_v48  ;;  %v671_v58 = vpop.f32.mrb[11].mxu1  ;;  %v677_v33 = vadd.f32 %v5033_v55, %v5740_v10 }
 0x107   : > { %5085 = vmatmul.mubr.f32.gmra.mrb[24].mxu1 %v709_v51  ;;  %v711_v59 = vmax.f32 %v597_v52, 0.0  ;;  %v672_v31 = vadd.f32 %v5740_v10, %v671_v58 }
 0x108   : > { %v710_v56 = vmax.f32 %v592_v54, 0.0  ;;  %v5012_v57 = vpop.f32.mrb[12].mxu0  ;;  %v727_v36 = vmax.f32 %v677_v33, 0.0 }
 0x109   : > { %v607_v60 = vadd.f32 %v5012_v57, %v5740_v10  ;;  %v601_v61 = vpop.f32.mrb[13].mxu0  ;;  %v5036_v63 = vpop.f32.mrb[12].mxu1  ;;  %v726_v34 = vmax.f32 %v672_v31, 0.0 }
 0x10a   : > { %v602_v62 = vadd.f32 %v5740_v10, %v601_v61  ;;  %5087 = vmatprep.mubr.f32.mxu1 %v710_v56  ;;  %v681_v3 = vpop.f32.mrb[13].mxu1  ;;  %v687_v37 = vadd.f32 %v5036_v63, %v5740_v10 }
 0x10b   : > { %5088 = vmatmul.mubr.f32.gmra.mrb[26].mxu1 %v711_v59  ;;  %v713_v4 = vmax.f32 %v607_v60, 0.0  ;;  %v682_v35 = vadd.f32 %v5740_v10, %v681_v3 }
 0x10c   : > { %v712_v0 = vmax.f32 %v602_v62, 0.0  ;;  %v5015_v1 = vpop.f32.mrb[14].mxu0  ;;  %v729_v40 = vmax.f32 %v687_v37, 0.0 }
 0x10d   : > { %v617_v5 = vadd.f32 %v5015_v1, %v5740_v10  ;;  %v611_v6 = vpop.f32.mrb[15].mxu0  ;;  %v5039_v8 = vpop.f32.mrb[14].mxu1  ;;  %v728_v38 = vmax.f32 %v682_v35, 0.0 }
 0x10e   : > { %v612_v7 = vadd.f32 %v5740_v10, %v611_v6  ;;  %5090 = vmatprep.mubr.f32.mxu1 %v712_v0  ;;  %v691_v13 = vpop.f32.mrb[15].mxu1  ;;  %v697_v41 = vadd.f32 %v5039_v8, %v5740_v10 }
 0x10f   : > { %5091 = vmatmul.mubr.f32.gmra.mrb[28].mxu1 %v713_v4  ;;  %v715_v14 = vmax.f32 %v617_v5, 0.0  ;;  %v692_v39 = vadd.f32 %v5740_v10, %v691_v13 }
 0x110   : > { %v714_v9 = vmax.f32 %v612_v7, 0.0  ;;  %v731_v43 = vmax.f32 %v697_v41, 0.0 }
 0x111   : > { %v730_v42 = vmax.f32 %v692_v39, 0.0 }
 0x112   : > { %5093 = vmatprep.mubr.f32.mxu1 %v714_v9 }
 0x113   : > { %5094 = vmatmul.mubr.f32.gmra.mrb[30].mxu1 %v715_v14 }
 0x114   : > { %5096 = vmatprep.mubr.f32.mxu1 %v716_v11 }
 0x117   : > { %5097 = vmatmul.mubr.f32.gmra.mrb[32].mxu1 %v717_v19 }
 0x118   : > { %5099 = vmatprep.mubr.f32.mxu1 %v718_v17 }
 0x11b   : > { %5100 = vmatmul.mubr.f32.gmra.mrb[34].mxu1 %v719_v25 }
 0x11c   : > { %5102 = vmatprep.mubr.f32.mxu1 %v720_v22 }
 0x11f   : > { %5103 = vmatmul.mubr.f32.gmra.mrb[36].mxu1 %v721_v15 }
 0x120   : > { %5105 = vmatprep.mubr.f32.mxu1 %v722_v27 }
 0x123   : > { %5106 = vmatmul.mubr.f32.gmra.mrb[38].mxu1 %v723_v29 }
 0x124   : > { %5108 = vmatprep.mubr.f32.mxu1 %v724_v30 }
 0x127   : > { %5109 = vmatmul.mubr.f32.gmra.mrb[40].mxu1 %v725_v32 }
 0x128   : > { %5111 = vmatprep.mubr.f32.mxu1 %v726_v34 }
 0x12b   : > { %5112 = vmatmul.mubr.f32.gmra.mrb[42].mxu1 %v727_v36 }
 0x12c   : > { %5114 = vmatprep.mubr.f32.mxu1 %v728_v38 }
 0x12f   : > { %5115 = vmatmul.mubr.f32.gmra.mrb[44].mxu1 %v729_v40 }
 0x130   : > { %5117 = vmatprep.mubr.f32.mxu1 %v730_v42 }
 0x133   : > { %5118 = vmatmul.mubr.f32.gmra.mrb[46].mxu1 %v731_v43 }
 0x1ca   : > { %v5074_v45 = vpop.f32.mrb[16].mxu1 }
 0x1cb   : > { %v827_v46 = vadd.f32 %v5074_v45, %v5789_v44  ;;  %v821_v47 = vpop.f32.mrb[17].mxu1 }
 0x1cc   : > { %v822_v48 = vadd.f32 %v5789_v44, %v821_v47 }
 0x1cd   : > { %v981_v50 = vmax.f32 %v827_v46, 0.0 }
 0x1ce   : > { %v980_v49 = vmax.f32 %v822_v48, 0.0  ;;  %v5077_v10 = vpop.f32.mrb[18].mxu1 }
 0x1cf   : > { %v837_v51 = vadd.f32 %v5077_v10, %v5789_v44  ;;  %v831_v52 = vpop.f32.mrb[19].mxu1 }
 0x1d0   : > { %v832_v53 = vadd.f32 %v5789_v44, %v831_v52  ;;  %5136 = vmatprep.mubr.msk.f32.mxu0 %vm1027_vm1, %v980_v49 }
 0x1d1   : > { %5137 = vmatmul.mubr.msk.f32.vlgmr.msra.gmra.mrb[16].mxu0 %vm1027_vm1, %v981_v50  ;;  %v983_v56 = vmax.f32 %v837_v51, 0.0 }
 0x1d2   : > { %v982_v54 = vmax.f32 %v832_v53, 0.0  ;;  %v5080_v55 = vpop.f32.mrb[20].mxu1 }
 0x1d3   : > { %v847_v57 = vadd.f32 %v5080_v55, %v5789_v44  ;;  %v841_v58 = vpop.f32.mrb[21].mxu1 }
 0x1d4   : > { %v842_v59 = vadd.f32 %v5789_v44, %v841_v58  ;;  %5139 = vmatprep.mubr.msk.f32.mxu0 %vm1027_vm1, %v982_v54 }
 0x1d5   : > { %5140 = vmatmul.mubr.msk.f32.gmra.mrb[18].mxu0 %vm1027_vm1, %v983_v56  ;;  %v985_v62 = vmax.f32 %v847_v57, 0.0 }
 0x1d6   : > { %v984_v60 = vmax.f32 %v842_v59, 0.0  ;;  %v5083_v61 = vpop.f32.mrb[22].mxu1 }
 0x1d7   : > { %v857_v63 = vadd.f32 %v5083_v61, %v5789_v44  ;;  %v851_v0 = vpop.f32.mrb[23].mxu1 }
 0x1d8   : > { %v852_v1 = vadd.f32 %v5789_v44, %v851_v0  ;;  %5142 = vmatprep.mubr.msk.f32.mxu0 %vm1027_vm1, %v984_v60 }
 0x1d9   : > { %5143 = vmatmul.mubr.msk.f32.gmra.mrb[20].mxu0 %vm1027_vm1, %v985_v62  ;;  %v987_v4 = vmax.f32 %v857_v63, 0.0 }
 0x1da   : > { %v986_v2 = vmax.f32 %v852_v1, 0.0  ;;  %v5086_v3 = vpop.f32.mrb[24].mxu1 }
 0x1db   : > { %v867_v5 = vadd.f32 %v5086_v3, %v5789_v44  ;;  %v861_v6 = vpop.f32.mrb[25].mxu1 }
 0x1dc   : > { %v862_v7 = vadd.f32 %v5789_v44, %v861_v6  ;;  %5145 = vmatprep.mubr.msk.f32.mxu0 %vm1027_vm1, %v986_v2 }
 0x1dd   : > { %5146 = vmatmul.mubr.msk.f32.gmra.mrb[22].mxu0 %vm1027_vm1, %v987_v4  ;;  %v989_v11 = vmax.f32 %v867_v5, 0.0 }
 0x1de   : > { %v988_v8 = vmax.f32 %v862_v7, 0.0  ;;  %v5089_v9 = vpop.f32.mrb[26].mxu1 }
 0x1df   : > { %v877_v12 = vadd.f32 %v5089_v9, %v5789_v44  ;;  %v871_v13 = vpop.f32.mrb[27].mxu1 }
 0x1e0   : > { %v872_v14 = vadd.f32 %v5789_v44, %v871_v13  ;;  %5148 = vmatprep.mubr.msk.f32.mxu0 %vm1027_vm1, %v988_v8 }
 0x1e1   : > { %5149 = vmatmul.mubr.msk.f32.gmra.mrb[24].mxu0 %vm1027_vm1, %v989_v11  ;;  %v991_v18 = vmax.f32 %v877_v12, 0.0 }
 0x1e2   : > { %v990_v16 = vmax.f32 %v872_v14, 0.0  ;;  %v5092_v17 = vpop.f32.mrb[28].mxu1  ;;  %v5858_v14 = vld [vmem:[%s6929_s6] ss:$0 sm:$0xff] }
 0x1e3   : > { %v887_v19 = vadd.f32 %v5092_v17, %v5789_v44  ;;  %v881_v20 = vpop.f32.mrb[29].mxu1 }
 0x1e4   : > { %v882_v21 = vadd.f32 %v5789_v44, %v881_v20  ;;  %5151 = vmatprep.mubr.msk.f32.mxu0 %vm1027_vm1, %v990_v16 }
 0x1e5   : > { %5152 = vmatmul.mubr.msk.f32.gmra.mrb[26].mxu0 %vm1027_vm1, %v991_v18  ;;  %v993_v25 = vmax.f32 %v887_v19, 0.0 }
 0x1e6   : > { %v992_v22 = vmax.f32 %v882_v21, 0.0  ;;  %v5095_v24 = vpop.f32.mrb[30].mxu1 }
 0x1e7   : > { %v897_v15 = vadd.f32 %v5095_v24, %v5789_v44  ;;  %v891_v26 = vpop.f32.mrb[31].mxu1 }
 0x1e8   : > { %v892_v27 = vadd.f32 %v5789_v44, %v891_v26  ;;  %5154 = vmatprep.mubr.msk.f32.mxu0 %vm1027_vm1, %v992_v22 }
 0x1e9   : > { %5155 = vmatmul.mubr.msk.f32.gmra.mrb[28].mxu0 %vm1027_vm1, %v993_v25  ;;  %v995_v23 = vmax.f32 %v897_v15, 0.0 }
 0x1ea   : > { %v994_v28 = vmax.f32 %v892_v27, 0.0  ;;  %v5098_v29 = vpop.f32.mrb[32].mxu1 }
 0x1eb   : > { %v907_v30 = vadd.f32 %v5098_v29, %v5789_v44  ;;  %v901_v31 = vpop.f32.mrb[33].mxu1 }
 0x1ec   : > { %v902_v32 = vadd.f32 %v5789_v44, %v901_v31  ;;  %5157 = vmatprep.mubr.msk.f32.mxu0 %vm1027_vm1, %v994_v28 }
 0x1ed   : > { %5158 = vmatmul.mubr.msk.f32.gmra.mrb[30].mxu0 %vm1027_vm1, %v995_v23  ;;  %v997_v35 = vmax.f32 %v907_v30, 0.0 }
 0x1ee   : > { %v996_v33 = vmax.f32 %v902_v32, 0.0  ;;  %v5101_v34 = vpop.f32.mrb[34].mxu1 }
 0x1ef   : > { %v917_v36 = vadd.f32 %v5101_v34, %v5789_v44  ;;  %v911_v37 = vpop.f32.mrb[35].mxu1 }
 0x1f0   : > { %v912_v38 = vadd.f32 %v5789_v44, %v911_v37  ;;  %5160 = vmatprep.mubr.msk.f32.mxu0 %vm1027_vm1, %v996_v33 }
 0x1f1   : > { %5161 = vmatmul.mubr.msk.f32.gmra.mrb[32].mxu0 %vm1027_vm1, %v997_v35  ;;  %v999_v41 = vmax.f32 %v917_v36, 0.0 }
 0x1f2   : > { %v998_v39 = vmax.f32 %v912_v38, 0.0  ;;  %v5104_v40 = vpop.f32.mrb[36].mxu1 }
 0x1f3   : > { %v927_v42 = vadd.f32 %v5104_v40, %v5789_v44  ;;  %v921_v43 = vpop.f32.mrb[37].mxu1 }
 0x1f4   : > { %v922_v45 = vadd.f32 %v5789_v44, %v921_v43  ;;  %5163 = vmatprep.mubr.msk.f32.mxu0 %vm1027_vm1, %v998_v39 }
 0x1f5   : > { %5164 = vmatmul.mubr.msk.f32.gmra.mrb[34].mxu0 %vm1027_vm1, %v999_v41  ;;  %v1001_v48 = vmax.f32 %v927_v42, 0.0 }
 0x1f6   : > { %v1000_v46 = vmax.f32 %v922_v45, 0.0  ;;  %v5107_v47 = vpop.f32.mrb[38].mxu1 }
 0x1f7   : > { %v937_v49 = vadd.f32 %v5107_v47, %v5789_v44  ;;  %v931_v10 = vpop.f32.mrb[39].mxu1 }
 0x1f8   : > { %v932_v50 = vadd.f32 %v5789_v44, %v931_v10  ;;  %5166 = vmatprep.mubr.msk.f32.mxu0 %vm1027_vm1, %v1000_v46 }
 0x1f9   : > { %v1003_v51 = vmax.f32 %v937_v49, 0.0  ;;  %5167 = vmatmul.mubr.msk.f32.gmra.mrb[36].mxu0 %vm1027_vm1, %v1001_v48 }
 0x1fa   : > { %v1002_v52 = vmax.f32 %v932_v50, 0.0  ;;  %v5110_v53 = vpop.f32.mrb[40].mxu1 }
 0x1fb   : > { %v947_v54 = vadd.f32 %v5110_v53, %v5789_v44  ;;  %v941_v55 = vpop.f32.mrb[41].mxu1 }
 0x1fc   : > { %5169 = vmatprep.mubr.msk.f32.mxu0 %vm1027_vm1, %v1002_v52  ;;  %v942_v56 = vadd.f32 %v5789_v44, %v941_v55 }
 0x1fd   : > { %5170 = vmatmul.mubr.msk.f32.gmra.mrb[38].mxu0 %vm1027_vm1, %v1003_v51  ;;  %v1005_v57 = vmax.f32 %v947_v54, 0.0 }
 0x1fe   : > { %v1004_v58 = vmax.f32 %v942_v56, 0.0  ;;  %v5113_v59 = vpop.f32.mrb[42].mxu1 }
 0x1ff   : > { %v957_v60 = vadd.f32 %v5113_v59, %v5789_v44  ;;  %v951_v61 = vpop.f32.mrb[43].mxu1 }
 0x200   : > { %5172 = vmatprep.mubr.msk.f32.mxu0 %vm1027_vm1, %v1004_v58  ;;  %v952_v62 = vadd.f32 %v5789_v44, %v951_v61 }
 0x201   : > { %5173 = vmatmul.mubr.msk.f32.gmra.mrb[40].mxu0 %vm1027_vm1, %v1005_v57  ;;  %v1007_v63 = vmax.f32 %v957_v60, 0.0 }
 0x202   : > { %v1006_v0 = vmax.f32 %v952_v62, 0.0  ;;  %v5116_v1 = vpop.f32.mrb[44].mxu1 }
 0x203   : > { %v967_v2 = vadd.f32 %v5116_v1, %v5789_v44  ;;  %v961_v3 = vpop.f32.mrb[45].mxu1 }
 0x204   : > { %5175 = vmatprep.mubr.msk.f32.mxu0 %vm1027_vm1, %v1006_v0  ;;  %v962_v4 = vadd.f32 %v5789_v44, %v961_v3 }
 0x205   : > { %5176 = vmatmul.mubr.msk.f32.gmra.mrb[42].mxu0 %vm1027_vm1, %v1007_v63  ;;  %v1009_v5 = vmax.f32 %v967_v2, 0.0 }
 0x206   : > { %v1008_v6 = vmax.f32 %v962_v4, 0.0  ;;  %v5119_v7 = vpop.f32.mrb[46].mxu1 }
 0x207   : > { %v977_v8 = vadd.f32 %v5119_v7, %v5789_v44  ;;  %v971_v9 = vpop.f32.mrb[47].mxu1 }
 0x208   : > { %5178 = vmatprep.mubr.msk.f32.mxu0 %vm1027_vm1, %v1008_v6  ;;  %v972_v11 = vadd.f32 %v5789_v44, %v971_v9  ;;  %v5865_v44 = vld [vmem:[%s6930_s7] ss:$0 sm:$0xff] }
 0x209   : > { %v1011_v12 = vmax.f32 %v977_v8, 0.0  ;;  %5179 = vmatmul.mubr.msk.f32.gmra.mrb[44].mxu0 %vm1027_vm1, %v1009_v5 }
 0x20a   : > { %v1010_v13 = vmax.f32 %v972_v11, 0.0 }
 0x20c   : > { %5181 = vmatprep.mubr.msk.f32.mxu0 %vm1027_vm1, %v1010_v13 }
 0x20d   : > { %5182 = vmatmul.mubr.msk.f32.gmra.mrb[46].mxu0 %vm1027_vm1, %v1011_v12 }
 0x2a4   : > { %v5138_v16 = vpop.f32.mrb[16].mxu0 }
 0x2a5   : > { %v1196_v17 = vadd.f32 %v5138_v16, %v5858_v14  ;;  %v1190_v18 = vpop.f32.mrb[17].mxu0 }
 0x2a6   : > { %v1191_v19 = vadd.f32 %v5858_v14, %v1190_v18 }
 0x2a7   : > { %v1350_v20 = vmax.f32 %v1196_v17, 0.0 }
 0x2a8   : > { %v1349_v21 = vmax.f32 %v1191_v19, 0.0  ;;  %v5141_v22 = vpop.f32.mrb[18].mxu0 }
 0x2a9   : > { %v1206_v24 = vadd.f32 %v5141_v22, %v5858_v14  ;;  %v1200_v25 = vpop.f32.mrb[19].mxu0  ;;  %v1389_v15 = vmul.f32 %v5865_v44, %v1350_v20 }
 0x2aa   : > { %v1201_v26 = vadd.f32 %v5858_v14, %v1200_v25  ;;  %v1388_v29 = vmul.f32 %v5865_v44, %v1349_v21 }
 0x2ab   : > { %v1352_v27 = vmax.f32 %v1206_v24, 0.0  ;;  %v1423_v28 = vsel %vm378_vm0, %v1389_v15, 0.0 }
 0x2ac   : > { %v1351_v23 = vmax.f32 %v1201_v26, 0.0  ;;  %1424 = vadd.xlane.f32.xlu0 %v1423_v28  ;;  %v5144_v30 = vpop.f32.mrb[20].mxu0  ;;  %v1420_v38 = vsel %vm378_vm0, %v1388_v29, 0.0 }
 0x2ad   : > { %v1216_v31 = vadd.f32 %v5144_v30, %v5858_v14  ;;  %v1210_v32 = vpop.f32.mrb[21].mxu0  ;;  %v1391_v33 = vmul.f32 %v5865_v44, %v1352_v27 }
 0x2ae   : > { %v1211_v34 = vadd.f32 %v5858_v14, %v1210_v32  ;;  %v1390_v35 = vmul.f32 %v5865_v44, %v1351_v23 }
 0x2af   : > { %v1354_v36 = vmax.f32 %v1216_v31, 0.0  ;;  %v1429_v37 = vsel %vm378_vm0, %v1391_v33, 0.0 }
 0x2b0   : > { %v1353_v39 = vmax.f32 %v1211_v34, 0.0  ;;  %1430 = vadd.xlane.f32.xlu1 %v1429_v37  ;;  %v5147_v40 = vpop.f32.mrb[22].mxu0  ;;  %1421 = vadd.xlane.f32.xlu0 %v1420_v38  ;;  %v1426_v45 = vsel %vm378_vm0, %v1390_v35, 0.0 }
 0x2b1   : > { %v1226_v41 = vadd.f32 %v5147_v40, %v5858_v14  ;;  %v1220_v42 = vpop.f32.mrb[23].mxu0  ;;  %v1393_v43 = vmul.f32 %v5865_v44, %v1354_v36 }
 0x2b2   : > { %v1221_v47 = vadd.f32 %v5858_v14, %v1220_v42  ;;  %v1392_v49 = vmul.f32 %v5865_v44, %v1353_v39 }
 0x2b3   : > { %v1356_v46 = vmax.f32 %v1226_v41, 0.0  ;;  %v1435_v48 = vsel %vm378_vm0, %v1393_v43, 0.0 }
 0x2b4   : > { %v5150_v10 = vpop.f32.mrb[24].mxu0  ;;  %1427 = vadd.xlane.f32.xlu1 %v1426_v45  ;;  %1436 = vadd.xlane.f32.xlu0 %v1435_v48  ;;  %v1355_v51 = vmax.f32 %v1221_v47, 0.0  ;;  %v1432_v53 = vsel %vm378_vm0, %v1392_v49, 0.0 }
 0x2b5   : > { %v1230_v50 = vpop.f32.mrb[25].mxu0  ;;  %v1236_v52 = vadd.f32 %v5150_v10, %v5858_v14  ;;  %v1395_v54 = vmul.f32 %v5865_v44, %v1356_v46 }
 0x2b6   : > { %v1231_v58 = vadd.f32 %v5858_v14, %v1230_v50  ;;  %v1394_v60 = vmul.f32 %v5865_v44, %v1355_v51 }
 0x2b7   : > { %v1358_v57 = vmax.f32 %v1236_v52, 0.0  ;;  %v1441_v59 = vsel %vm378_vm0, %v1395_v54, 0.0 }
 0x2b8   : > { %v5153_v55 = vpop.f32.mrb[26].mxu0  ;;  %1433 = vadd.xlane.f32.xlu0 %v1432_v53  ;;  %v1357_v63 = vmax.f32 %v1231_v58, 0.0  ;;  %v1438_v1 = vsel %vm378_vm0, %v1394_v60, 0.0 }
 0x2b9   : > { %v1240_v56 = vpop.f32.mrb[27].mxu0  ;;  %v1246_v0 = vadd.f32 %v5153_v55, %v5858_v14  ;;  %v1397_v2 = vmul.f32 %v5865_v44, %v1358_v57 }
 0x2ba   : > { %v1241_v5 = vadd.f32 %v5858_v14, %v1240_v56  ;;  %v1396_v8 = vmul.f32 %v5865_v44, %v1357_v63 }
 0x2bb   : > { %v1360_v6 = vmax.f32 %v1246_v0, 0.0  ;;  %v1447_v7 = vsel %vm378_vm0, %v1397_v2, 0.0 }
 0x2bc   : > { %v5156_v61 = vpop.f32.mrb[28].mxu0  ;;  %1442 = vadd.xlane.f32.xlu0 %v1441_v59  ;;  %v1359_v12 = vmax.f32 %v1241_v5, 0.0  ;;  %v1444_v17 = vsel %vm378_vm0, %v1396_v8, 0.0 }
 0x2bd   : > { %v1250_v62 = vpop.f32.mrb[29].mxu0  ;;  %v1399_v18 = vmul.f32 %v5865_v44, %v1360_v6  ;;  %v1256_v46 = vadd.f32 %v5156_v61, %v5858_v14 }
 0x2be   : > { %v1251_v16 = vadd.f32 %v5858_v14, %v1250_v62  ;;  %v1398_v25 = vmul.f32 %v5865_v44, %v1359_v12 }
 0x2bf   : > { %v1453_v27 = vsel %vm378_vm0, %v1399_v18, 0.0  ;;  %v1362_v55 = vmax.f32 %v1256_v46, 0.0 }
 0x2c0   : > { %v5893_v3 = vpop.f32.mrb[30].mxu0  ;;  %1439 = vadd.xlane.f32.xlu0 %v1438_v1  ;;  %v1361_v15 = vmax.f32 %v1251_v16, 0.0  ;;  %v1450_v33 = vsel %vm378_vm0, %v1398_v25, 0.0 }
 0x2c1   : > { %v1260_v4 = vpop.f32.mrb[31].mxu0  ;;  %v1266_v2 = vadd.f32 %v5893_v3, %v5858_v14 }
 0x2c2   : > { %v1400_v38 = vmul.f32 %v5865_v44, %v1361_v15  ;;  %v1261_v56 = vadd.f32 %v5858_v14, %v1260_v4  ;;  %v1401_v4 = vmul.f32 %v5865_v44, %v1362_v55 }
 0x2c4   : > { %v5162_v9 = vpop.f32.mrb[32].mxu0  ;;  %1448 = vadd.xlane.f32.xlu0 %v1447_v7  ;;  %v1456_v48 = vsel %vm378_vm0, %v1400_v38, 0.0  ;;  %v1363_v6 = vmax.f32 %v1261_v56, 0.0 }
 0x2c5   : > { %v1270_v11 = vpop.f32.mrb[33].mxu0  ;;  %v1276_v26 = vadd.f32 %v5162_v9, %v5858_v14 }
 0x2c6   : > { %v1271_v13 = vadd.f32 %v5858_v14, %v1270_v11  ;;  %v1402_v25 = vmul.f32 %v5865_v44, %v1363_v6 }
 0x2c7   : > { %v1366_v35 = vmax.f32 %v1276_v26, 0.0 }
 0x2c8   : > { %v1365_v19 = vmax.f32 %v1271_v13, 0.0  ;;  %v5165_v20 = vpop.f32.mrb[34].mxu0  ;;  %1445 = vadd.xlane.f32.xlu0 %v1444_v17 }
 0x2c9   : > { %v1280_v21 = vpop.f32.mrb[35].mxu0  ;;  %v1286_v36 = vadd.f32 %v5165_v20, %v5858_v14  ;;  %v1405_v10 = vmul.f32 %v5865_v44, %v1366_v35  ;;  %v5479_v35 = vmov 0  }
 0x2ca   : > { %v1281_v22 = vadd.f32 %v5858_v14, %v1280_v21  ;;  %v1404_v24 = vmul.f32 %v5865_v44, %v1365_v19  ;;  %5285 = vset.pattern.permute.xlu1 %v5479_v35  ;;  %5286 = vset.pattern.permute.xlu0 %v5479_v35 }
 0x2cb   : > { %v1368_v47 = vmax.f32 %v1286_v36, 0.0  ;;  %v1471_v57 = vsel %vm378_vm0, %v1405_v10, 0.0  ;;  %v1462_v36 = vsel %vm378_vm0, %v1402_v25, 0.0 }
 0x2cc   : > { %v1367_v28 = vmax.f32 %v1281_v22, 0.0  ;;  %v5168_v29 = vpop.f32.mrb[36].mxu0  ;;  %1454 = vadd.xlane.f32.xlu0 %v1453_v27  ;;  %v1468_v23 = vsel %vm378_vm0, %v1404_v24, 0.0  ;;  %v1364_v22 = vmax.f32 %v1266_v2, 0.0  ;;  %v1459_v24 = vsel %vm378_vm0, %v1401_v4, 0.0 }
 0x2cd   : > { %v1296_v30 = vadd.f32 %v5168_v29, %v5858_v14  ;;  %v1290_v31 = vpop.f32.mrb[37].mxu0  ;;  %1469 = vadd.xlane.f32.xlu1 %v1468_v23  ;;  %v1407_v58 = vmul.f32 %v5865_v44, %v1368_v47 }
 0x2ce   : > { %v1291_v32 = vadd.f32 %v5858_v14, %v1290_v31  ;;  %v1406_v34 = vmul.f32 %v5865_v44, %v1367_v28 }
 0x2cf   : > { %v1370_v37 = vmax.f32 %v1296_v30, 0.0  ;;  %v1477_v8 = vsel %vm378_vm0, %v1407_v58, 0.0 }
 0x2d0   : > { %v1369_v39 = vmax.f32 %v1291_v32, 0.0  ;;  %v5171_v40 = vpop.f32.mrb[38].mxu0  ;;  %1451 = vadd.xlane.f32.xlu0 %v1450_v33  ;;  %v1474_v41 = vsel %vm378_vm0, %v1406_v34, 0.0 }
 0x2d1   : > { %v1306_v42 = vadd.f32 %v5171_v40, %v5858_v14  ;;  %v1300_v43 = vpop.f32.mrb[39].mxu0  ;;  %1475 = vadd.xlane.f32.xlu1 %v1474_v41  ;;  %v1409_v45 = vmul.f32 %v5865_v44, %v1370_v37  ;;  %v1403_v37 = vmul.f32 %v5865_v44, %v1364_v22 }
 0x2d2   : > { %v1301_v51 = vadd.f32 %v5858_v14, %v1300_v43  ;;  %v1408_v53 = vmul.f32 %v5865_v44, %v1369_v39 }
 0x2d3   : > { %v1483_v49 = vsel %vm378_vm0, %v1409_v45, 0.0  ;;  %v1372_v50 = vmax.f32 %v1306_v42, 0.0  ;;  %v1465_v43 = vsel %vm378_vm0, %v1403_v37, 0.0 }
 0x2d4   : > { %1457 = vadd.xlane.f32.xlu0 %v1456_v48  ;;  %v5174_v52 = vpop.f32.mrb[40].mxu0  ;;  %v1371_v59 = vmax.f32 %v1301_v51, 0.0  ;;  %v1480_v61 = vsel %vm378_vm0, %v1408_v53, 0.0 }
 0x2d5   : > { %1484 = vadd.xlane.f32.xlu1 %v1483_v49  ;;  %v1310_v54 = vpop.f32.mrb[41].mxu0  ;;  %v1316_v60 = vadd.f32 %v5174_v52, %v5858_v14  ;;  %v1411_v62 = vmul.f32 %v5865_v44, %v1372_v50  ;;  %v5964_v50 = vstv %s1516_s29 }
 0x2d6   : > { %v1311_v7 = vadd.f32 %v5858_v14, %v1310_v54  ;;  %v1410_v16 = vmul.f32 %v5865_v44, %v1371_v59 }
 0x2d7   : > { %v1374_v11 = vmax.f32 %v1316_v60, 0.0  ;;  %v1489_v12 = vsel %vm378_vm0, %v1411_v62, 0.0 }
 0x2d8   : > { %1472 = vadd.xlane.f32.xlu0 %v1471_v57  ;;  %v5177_v63 = vpop.f32.mrb[42].mxu0  ;;  %v1373_v26 = vmax.f32 %v1311_v7, 0.0  ;;  %v1486_v27 = vsel %vm378_vm0, %v1410_v16, 0.0 }
 0x2d9   : > { %1481 = vadd.xlane.f32.xlu1 %v1480_v61  ;;  %v1326_v0 = vadd.f32 %v5177_v63, %v5858_v14  ;;  %v1320_v1 = vpop.f32.mrb[43].mxu0  ;;  %v1413_v28 = vmul.f32 %v5865_v44, %v1374_v11 }
 0x2da   : > { %v1321_v5 = vadd.f32 %v5858_v14, %v1320_v1  ;;  %v1412_v40 = vmul.f32 %v5865_v44, %v1373_v26 }
 0x2db   : > { %v1376_v9 = vmax.f32 %v1326_v0, 0.0  ;;  %v1495_v39 = vsel %vm378_vm0, %v1413_v28, 0.0 }
 0x2dc   : > { %1478 = vadd.xlane.f32.xlu0 %v1477_v8  ;;  %v1375_v13 = vmax.f32 %v1321_v5, 0.0  ;;  %v5180_v17 = vpop.f32.mrb[44].mxu0  ;;  %v1492_v45 = vsel %vm378_vm0, %v1412_v40, 0.0 }
 0x2dd   : > { %1490 = vadd.xlane.f32.xlu1 %v1489_v12  ;;  %v1336_v3 = vadd.f32 %v5180_v17, %v5858_v14  ;;  %v1330_v18 = vpop.f32.mrb[45].mxu0  ;;  %v1415_v19 = vmul.f32 %v5865_v44, %v1376_v9  ;;  %v1774_v9 = vlaneseq }
 0x2de   : > { %v1331_v20 = vadd.f32 %v5858_v14, %v1330_v18  ;;  %v1414_v21 = vmul.f32 %v5865_v44, %v1375_v13 }
 0x2df   : > { %v1378_v15 = vmax.f32 %v1336_v3, 0.0  ;;  %v1501_v46 = vsel %vm378_vm0, %v1415_v19, 0.0  ;;  %v5974_v18 = vshrl.u32 %v1774_v9, 7  ;;  %v5480_v19 = vmov 1966171168  }
 0x2e0   : > { %1460 = vadd.xlane.f32.xlu0 %v1459_v24  ;;  %v1377_v29 = vmax.f32 %v1331_v20, 0.0  ;;  %v5183_v23 = vpop.f32.mrb[46].mxu0  ;;  %v1498_v47 = vsel %vm378_vm0, %v1414_v21, 0.0  ;;  %v2803_v20 = vunpack.c.l.s4 %v5480_v19  ;;  %vm4670_vm1 = vcmp.lt.s32.totalorder %v1774_v9, 256 }
 0x2e1   : > { %1487 = vadd.xlane.f32.xlu1 %v1486_v27  ;;  %v1346_v30 = vadd.f32 %v5183_v23, %v5858_v14  ;;  %v1340_v31 = vpop.f32.mrb[47].mxu0  ;;  %v1417_v32 = vmul.f32 %v5865_v44, %v1378_v15  ;;  %v5978_v28 = vsub.s32 0, %v5974_v18  ;;  %v5994_v35 = vsub.s32 5, %v5974_v18 }
 0x2e2   : > { %v1341_v33 = vadd.f32 %v5858_v14, %v1340_v31  ;;  %v1416_v34 = vmul.f32 %v5865_v44, %v1377_v29  ;;  %v2804_v29 = vunpack.c.0.s8 %v2803_v20  ;;  %v5985_v31 = vsub.s32 2, %v5974_v18 }
 0x2e3   : > { %v1380_v38 = vmax.f32 %v1346_v30, 0.0  ;;  %v1507_v48 = vsel %vm378_vm0, %v1417_v32, 0.0  ;;  %v5982_v30 = vsub.s32 1, %v5974_v18 }
 0x2e4   : > { %1463 = vadd.xlane.f32.xlu0 %v1462_v36  ;;  %v1379_v41 = vmax.f32 %v1341_v33, 0.0  ;;  %v1504_v49 = vsel %vm378_vm0, %v1416_v34, 0.0  ;;  %v5988_v33 = vsub.s32 3, %v5974_v18  ;;  %v5991_v34 = vsub.s32 4, %v5974_v18 }
 0x2e5   : > { %1496 = vadd.xlane.f32.xlu1 %v1495_v39  ;;  %v1419_v42 = vmul.f32 %v5865_v44, %v1380_v38  ;;  %v5997_v38 = vsub.s32 6, %v5974_v18  ;;  %v6000_v39 = vsub.s32 7, %v5974_v18 }
 0x2e6   : > { %v1418_v14 = vmul.f32 %v5865_v44, %v1379_v41 }
 0x2e7   : > { %v1513_v10 = vsel %vm378_vm0, %v1419_v42, 0.0 }
 0x2e8   : > { %1466 = vadd.xlane.f32.xlu0 %v1465_v43  ;;  %v1510_v44 = vsel %vm378_vm0, %v1418_v14, 0.0  ;;  %v6003_v14 = vsub.s32 %v2804_v29, %v5974_v18  ;;  %vm4571_vm0 = vcmask 1048512  }
 0x2e9   : > { %1493 = vadd.xlane.f32.xlu1 %v1492_v45 }
 0x2ed   : > { %1502 = vadd.xlane.f32.xlu1 %v1501_v46 }
 0x2f1   : > { %1499 = vadd.xlane.f32.xlu1 %v1498_v47 }
 0x2f5   : > { %1508 = vadd.xlane.f32.xlu1 %v1507_v48 }
 0x2f9   : > { %1505 = vadd.xlane.f32.xlu1 %v1504_v49 }
 0x2fd   : > { %1511 = vadd.xlane.f32.xlu1 %v1510_v44 }
 0x301   : > { %1514 = vadd.xlane.f32.xlu1 %v1513_v10 }
 0x339   : > { %v1425_v51 = vpop.xlane.xlu0 %1424 }
 0x33a   : > { %v1519_v52 = vadd.f32 %v5964_v50, %v1425_v51 }
 0x33c   : > { %v4823_v53 = vmul.f32 -1.442695, %v1519_v52 }
 0x33d   : > { %v1431_v54 = vpop.xlane.xlu1 %1430  ;;  %v1422_v55 = vpop.xlane.xlu0 %1421 }
 0x33e   : > { %5287 = vpow2.f32 %v4823_v53  ;;  %v1521_v56 = vadd.f32 %v5964_v50, %v1431_v54  ;;  %v1518_v57 = vadd.f32 %v5964_v50, %v1422_v55 }
 0x340   : > { %v4825_v58 = vmul.f32 -1.442695, %v1521_v56  ;;  %v4822_v59 = vmul.f32 -1.442695, %v1518_v57 }
 0x341   : > { %v1428_v60 = vpop.xlane.xlu1 %1427  ;;  %v1437_v61 = vpop.xlane.xlu0 %1436 }
 0x342   : > { %5289 = vpow2.f32 %v4825_v58  ;;  %v1520_v62 = vadd.f32 %v5964_v50, %v1428_v60  ;;  %v1523_v63 = vadd.f32 %v5964_v50, %v1437_v61 }
 0x343   : > { %5291 = vpow2.f32 %v4822_v59 }
 0x344   : > { %v4824_v0 = vmul.f32 -1.442695, %v1520_v62  ;;  %v4827_v1 = vmul.f32 -1.442695, %v1523_v63 }
 0x345   : > { %v1434_v2 = vpop.xlane.xlu0 %1433 }
 0x346   : > { %5293 = vpow2.f32 %v4824_v0  ;;  %v1522_v4 = vadd.f32 %v5964_v50, %v1434_v2 }
 0x347   : > { %5295 = vpow2.f32 %v4827_v1 }
 0x348   : > { %v5288_v5 = vpop.eup %5287  ;;  %v4826_v6 = vmul.f32 -1.442695, %v1522_v4 }
 0x349   : > { %v1647_v7 = vadd.f32 1.0, %v5288_v5  ;;  %v1443_v8 = vpop.xlane.xlu0 %1442 }
 0x34a   : > { %5297 = vpow2.f32 %v4826_v6  ;;  %v1525_v11 = vadd.f32 %v5964_v50, %v1443_v8 }
 0x34b   : > { %5299 = vrcp.f32 %v1647_v7 }
 0x34c   : > { %v5290_v12 = vpop.eup %5289  ;;  %v4829_v13 = vmul.f32 -1.442695, %v1525_v11 }
 0x34d   : > { %v5292_v16 = vpop.eup %5291  ;;  %v1649_v17 = vadd.f32 1.0, %v5290_v12  ;;  %v1440_v3 = vpop.xlane.xlu0 %1439 }
 0x34e   : > { %5301 = vpow2.f32 %v4829_v13  ;;  %v1524_v21 = vadd.f32 %v5964_v50, %v1440_v3  ;;  %v1646_v24 = vadd.f32 1.0, %v5292_v16 }
 0x34f   : > { %5303 = vrcp.f32 %v1649_v17 }
 0x350   : > { %v5294_v22 = vpop.eup %5293  ;;  %v4828_v25 = vmul.f32 -1.442695, %v1524_v21 }
 0x351   : > { %v5296_v15 = vpop.eup %5295  ;;  %v1648_v26 = vadd.f32 1.0, %v5294_v22  ;;  %v1449_v27 = vpop.xlane.xlu0 %1448 }
 0x352   : > { %5305 = vpow2.f32 %v4828_v25  ;;  %v1527_v23 = vadd.f32 %v5964_v50, %v1449_v27  ;;  %v1651_v32 = vadd.f32 1.0, %v5296_v15 }
 0x353   : > { %5307 = vrcp.f32 %v1646_v24 }
 0x354   : > { %v5298_v36 = vpop.eup %5297  ;;  %v4831_v37 = vmul.f32 -1.442695, %v1527_v23  ;;  %5309 = vrcp.f32 %v1648_v26 }
 0x355   : > { %v5300_v40 = vpop.eup %5299  ;;  %v1650_v41 = vadd.f32 1.0, %v5298_v36  ;;  %v1446_v42 = vpop.xlane.xlu0 %1445 }
 0x356   : > { %5311 = vpow2.f32 %v4831_v37  ;;  %v1526_v43 = vadd.f32 %v5964_v50, %v1446_v42  ;;  %v1809_v45 = vrot.slane %v5300_v40, %v5978_v28  ;;  %v1813_v46 = vrot.slane %v5300_v40, %v5982_v30 }
 0x357   : > { %5313 = vrcp.f32 %v1651_v32  ;;  %v1817_v47 = vrot.slane %v5300_v40, %v5985_v31  ;;  %v1821_v48 = vrot.slane %v5300_v40, %v5988_v33  ;;  %v1825_v49 = vrot.slane %v5300_v40, %v5991_v34 }
 0x358   : > { %v5302_v44 = vpop.eup %5301  ;;  %v4830_v10 = vmul.f32 -1.442695, %v1526_v43  ;;  %v1829_v51 = vrot.slane %v5300_v40, %v5994_v35  ;;  %v1833_v52 = vrot.slane %v5300_v40, %v5997_v38  ;;  %v1837_v53 = vrot.slane %v5300_v40, %v6000_v39 }
 0x359   : > { %v6014_v54 = vpop.eup %5303  ;;  %5315 = vrcp.f32 %v1650_v41  ;;  %v1653_v55 = vadd.f32 1.0, %v5302_v44  ;;  %v1455_v56 = vpop.xlane.xlu0 %1454  ;;  %v2847_v57 = vcombine.low %v1809_v45, %v1813_v46  ;;  %v2848_v58 = vcombine.low %v1817_v47, %v1821_v48 }
 0x35a   : > { %5317 = vpow2.f32 %v4830_v10  ;;  %v1529_v59 = vadd.f32 %v5964_v50, %v1455_v56  ;;  %v1470_v60 = vpop.xlane.xlu1 %1469  ;;  %v2849_v61 = vcombine.low %v1825_v49, %v1829_v51  ;;  %v2850_v62 = vcombine.low %v1833_v52, %v1837_v53 }
 0x35b   : > { %5319 = vrcp.f32 %v1653_v55  ;;  %v1534_v63 = vadd.f32 %v5964_v50, %v1470_v60  ;;  %v2857_v0 = vrot.slane %v2847_v57, %v6003_v14  ;;  %v2864_v1 = vrot.slane %v2848_v58, %v6003_v14 }
 0x35c   : > { %v5306_v2 = vpop.eup %5305  ;;  %v4833_v4 = vmul.f32 -1.442695, %v1529_v59  ;;  %v2871_v5 = vrot.slane %v2849_v61, %v6003_v14  ;;  %v2878_v6 = vrot.slane %v2850_v62, %v6003_v14  ;;  %v1873_v7 = vrot.slane %v6014_v54, %v5978_v28 }
 0x35d   : > { %v1652_v8 = vadd.f32 1.0, %v5306_v2  ;;  %v4838_v11 = vmul.f32 -1.442695, %v1534_v63  ;;  %v1452_v12 = vpop.xlane.xlu0 %1451  ;;  %v2879_v13 = vcombine.low %v2857_v0, %v2864_v1  ;;  %v1877_v16 = vrot.slane %v6014_v54, %v5982_v30  ;;  %v6026_v17 = vpop.eup %5307 }
 0x35e   : > { %5321 = vpow2.f32 %v4833_v4  ;;  %v1528_v3 = vadd.f32 %v5964_v50, %v1452_v12  ;;  %v1476_v19 = vpop.xlane.xlu1 %1475  ;;  %v2880_v20 = vcombine.low %v2871_v5, %v2878_v6  ;;  %v1881_v21 = vrot.slane %v6014_v54, %v5985_v31  ;;  %v6031_v22 = vpop.eup %5309 }
 0x35f   : > { %5323 = vrcp.f32 %v1652_v8  ;;  %v1536_v24 = vadd.f32 %v5964_v50, %v1476_v19  ;;  %v2887_v25 = vrot.slane %v2879_v13, %v6003_v14  ;;  %v1885_v15 = vrot.slane %v6014_v54, %v5988_v33 }
 0x360   : > { %v5312_v26 = vpop.eup %5311  ;;  %5325 = vpow2.f32 %v4838_v11  ;;  %v4832_v27 = vmul.f32 -1.442695, %v1528_v3  ;;  %v2894_v29 = vrot.slane %v2880_v20, %v6003_v14  ;;  %v1889_v23 = vrot.slane %v6014_v54, %v5991_v34 }
 0x361   : > { %v6040_v32 = vpop.eup %5313  ;;  %v1655_v36 = vadd.f32 1.0, %v5312_v26  ;;  %v4840_v37 = vmul.f32 -1.442695, %v1536_v24  ;;  %v1458_v40 = vpop.xlane.xlu0 %1457  ;;  %v1893_v41 = vrot.slane %v6014_v54, %v5994_v35  ;;  %v1897_v42 = vrot.slane %v6014_v54, %v5997_v38 }
 0x362   : > { %5327 = vpow2.f32 %v4832_v27  ;;  %v1530_v43 = vadd.f32 %v5964_v50, %v1458_v40  ;;  %v2895_v45 = vcombine.low %v2887_v25, %v2894_v29  ;;  %v1485_v46 = vpop.xlane.xlu1 %1484  ;;  %v1901_v47 = vrot.slane %v6014_v54, %v6000_v39 }
 0x363   : > { %v6049_v48 = vpop.eup %5315  ;;  %5329 = vrcp.f32 %v1655_v36  ;;  %v1539_v49 = vadd.f32 %v5964_v50, %v1485_v46  ;;  %v2945_v44 = vcombine.low %v1873_v7, %v1877_v16  ;;  %v2946_v10 = vcombine.low %v1881_v21, %v1885_v15 }
 0x364   : > { %v5318_v51 = vpop.eup %5317  ;;  %5331 = vpow2.f32 %v4840_v37  ;;  %v4834_v52 = vmul.f32 -1.442695, %v1530_v43  ;;  %4370 = vperm.xlu1 %5285, %v2895_v45   ;;  %v2947_v53 = vcombine.low %v1889_v23, %v1893_v41  ;;  %v2948_v55 = vcombine.low %v1897_v42, %v1901_v47 }
 0x365   : > { %v6052_v56 = vpop.eup %5319  ;;  %v1654_v57 = vadd.f32 1.0, %v5318_v51  ;;  %v4843_v58 = vmul.f32 -1.442695, %v1539_v49  ;;  %v1473_v59 = vpop.xlane.xlu0 %1472  ;;  %v2955_v54 = vrot.slane %v2945_v44, %v6003_v14  ;;  %v2962_v60 = vrot.slane %v2946_v10, %v6003_v14 }
 0x366   : > { %5333 = vpow2.f32 %v4834_v52  ;;  %v1535_v61 = vadd.f32 %v5964_v50, %v1473_v59  ;;  %v2969_v62 = vrot.slane %v2947_v53, %v6003_v14  ;;  %v2976_v63 = vrot.slane %v2948_v55, %v6003_v14  ;;  %v1482_v0 = vpop.xlane.xlu1 %1481 }
 0x367   : > { %5335 = vrcp.f32 %v1654_v57  ;;  %v2977_v1 = vcombine.low %v2955_v54, %v2962_v60  ;;  %v1538_v2 = vadd.f32 %v5964_v50, %v1482_v0  ;;  %v1777_v4 = vrot.slane %v6026_v17, %v5978_v28 }
 0x368   : > { %v5322_v5 = vpop.eup %5321  ;;  %5337 = vpow2.f32 %v4843_v58  ;;  %v4839_v6 = vmul.f32 -1.442695, %v1535_v61  ;;  %v2978_v7 = vcombine.low %v2969_v62, %v2976_v63  ;;  %v1781_v8 = vrot.slane %v6026_v17, %v5982_v30 }
 0x369   : > { %v6064_v11 = vpop.eup %5323  ;;  %v1657_v12 = vadd.f32 1.0, %v5322_v5  ;;  %v2985_v13 = vrot.slane %v2977_v1, %v6003_v14  ;;  %v4842_v16 = vmul.f32 -1.442695, %v1538_v2  ;;  %v1785_v3 = vrot.slane %v6026_v17, %v5985_v31  ;;  %v1479_v27 = vpop.xlane.xlu0 %1478 }
 0x36a   : > { %v5326_v19 = vpop.eup %5325  ;;  %5339 = vpow2.f32 %v4839_v6  ;;  %v2992_v20 = vrot.slane %v2978_v7, %v6003_v14  ;;  %v1789_v21 = vrot.slane %v6026_v17, %v5988_v33  ;;  %v1793_v24 = vrot.slane %v6026_v17, %v5991_v34  ;;  %v1491_v52 = vpop.xlane.xlu1 %1490 }
 0x36b   : > { %5341 = vrcp.f32 %v1657_v12  ;;  %v1662_v25 = vadd.f32 1.0, %v5326_v19  ;;  %v1797_v15 = vrot.slane %v6026_v17, %v5994_v35  ;;  %v1801_v26 = vrot.slane %v6026_v17, %v5997_v38 }
 0x36c   : > { %v5328_v29 = vpop.eup %5327  ;;  %v2993_v23 = vcombine.low %v2985_v13, %v2992_v20  ;;  %5343 = vpow2.f32 %v4842_v16  ;;  %v1805_v36 = vrot.slane %v6026_v17, %v6000_v39  ;;  %v2798_v37 = vcombine.low %v1777_v4, %v1781_v8 }
 0x36d   : > { %v6080_v40 = vpop.eup %5329  ;;  %5345 = vrcp.f32 %v1662_v25  ;;  %v1656_v41 = vadd.f32 1.0, %v5328_v29  ;;  %v2799_v42 = vcombine.low %v1785_v3, %v1789_v21  ;;  %v2800_v43 = vcombine.low %v1793_v24, %v1797_v15  ;;  %v1461_v24 = vpop.xlane.xlu0 %1460 }
 0x36e   : > { %v5332_v45 = vpop.eup %5331  ;;  %4376 = vperm.xlu1 %5285, %v2993_v23   ;;  %v2801_v46 = vcombine.low %v1801_v26, %v1805_v36  ;;  %v2808_v47 = vrot.slane %v2798_v37, %v6003_v14  ;;  %v1537_v49 = vadd.f32 %v5964_v50, %v1479_v27  ;;  %v1841_v44 = vrot.slane %v6031_v22, %v5978_v28  ;;  %v1488_v25 = vpop.xlane.xlu1 %1487 }
 0x36f   : > { %5347 = vrcp.f32 %v1656_v41  ;;  %v1664_v10 = vadd.f32 1.0, %v5332_v45  ;;  %v2815_v17 = vrot.slane %v2799_v42, %v6003_v14  ;;  %v2822_v51 = vrot.slane %v2800_v43, %v6003_v14 }
 0x370   : > { %v5334_v53 = vpop.eup %5333  ;;  %v2829_v55 = vrot.slane %v2801_v46, %v6003_v14  ;;  %v4841_v57 = vmul.f32 -1.442695, %v1537_v49  ;;  %v1845_v58 = vrot.slane %v6031_v22, %v5982_v30  ;;  %v1849_v59 = vrot.slane %v6031_v22, %v5985_v31 }
 0x371   : > { %v6093_v54 = vpop.eup %5335  ;;  %5349 = vrcp.f32 %v1664_v10  ;;  %v1658_v60 = vadd.f32 1.0, %v5334_v53  ;;  %v2830_v61 = vcombine.low %v2808_v47, %v2815_v17  ;;  %v1853_v62 = vrot.slane %v6031_v22, %v5988_v33 }
 0x372   : > { %v5338_v63 = vpop.eup %5337  ;;  %v2831_v0 = vcombine.low %v2822_v51, %v2829_v55  ;;  %5351 = vpow2.f32 %v4841_v57  ;;  %v1857_v1 = vrot.slane %v6031_v22, %v5991_v34  ;;  %v1861_v2 = vrot.slane %v6031_v22, %v5994_v35 }
 0x373   : > { %5353 = vrcp.f32 %v1658_v60  ;;  %v1667_v4 = vadd.f32 1.0, %v5338_v63  ;;  %v2838_v5 = vrot.slane %v2830_v61, %v6003_v14  ;;  %v1865_v6 = vrot.slane %v6031_v22, %v5997_v38  ;;  %v1464_v60 = vpop.xlane.xlu0 %1463 }
 0x374   : > { %v5340_v7 = vpop.eup %5339  ;;  %v2845_v8 = vrot.slane %v2831_v0, %v6003_v14  ;;  %v1869_v12 = vrot.slane %v6031_v22, %v6000_v39  ;;  %v2896_v13 = vcombine.low %v1841_v44, %v1845_v58  ;;  %v2897_v16 = vcombine.low %v1849_v59, %v1853_v62 }
 0x375   : > { %v6107_v3 = vpop.eup %5341  ;;  %5355 = vrcp.f32 %v1667_v4  ;;  %v1663_v19 = vadd.f32 1.0, %v5340_v7  ;;  %v2898_v20 = vcombine.low %v1857_v1, %v1861_v2  ;;  %v1541_v21 = vadd.f32 %v5964_v50, %v1491_v52  ;;  %v1497_v1 = vpop.xlane.xlu1 %1496 }
 0x376   : > { %v5344_v15 = vpop.eup %5343  ;;  %v2846_v26 = vcombine.low %v2838_v5, %v2845_v8  ;;  %v2899_v27 = vcombine.low %v1865_v6, %v1869_v12  ;;  %v2906_v29 = vrot.slane %v2896_v13, %v6003_v14  ;;  %v2913_v23 = vrot.slane %v2897_v16, %v6003_v14 }
 0x377   : > { %v6112_v36 = vpop.eup %5345  ;;  %5357 = vrcp.f32 %v1663_v19  ;;  %v1666_v22 = vadd.f32 1.0, %v5344_v15  ;;  %v2920_v37 = vrot.slane %v2898_v20, %v6003_v14  ;;  %v4845_v41 = vmul.f32 -1.442695, %v1541_v21 }
 0x378   : > { %4367 = vperm.xlu0 %5286, %v2846_v26   ;;  %v2927_v42 = vrot.slane %v2899_v27, %v6003_v14  ;;  %v2928_v43 = vcombine.low %v2906_v29, %v2913_v23  ;;  %v1531_v45 = vadd.f32 %v5964_v50, %v1461_v24  ;;  %v1540_v46 = vadd.f32 %v5964_v50, %v1488_v25 }
 0x379   : > { %v6118_v47 = vpop.eup %5347  ;;  %5359 = vrcp.f32 %v1666_v22  ;;  %v1937_v49 = vrot.slane %v6040_v32, %v5978_v28  ;;  %v1941_v44 = vrot.slane %v6040_v32, %v5982_v30  ;;  %v1945_v10 = vrot.slane %v6040_v32, %v5985_v31 }
 0x37a   : > { %v2929_v17 = vcombine.low %v2920_v37, %v2927_v42  ;;  %v2936_v51 = vrot.slane %v2928_v43, %v6003_v14  ;;  %5361 = vpow2.f32 %v4845_v41  ;;  %v4835_v52 = vmul.f32 -1.442695, %v1531_v45  ;;  %v1467_v43 = vpop.xlane.xlu0 %1466  ;;  %v1494_v45 = vpop.xlane.xlu1 %1493 }
 0x37b   : > { %v6127_v53 = vpop.eup %5349  ;;  %v4844_v55 = vmul.f32 -1.442695, %v1540_v46  ;;  %v1949_v57 = vrot.slane %v6040_v32, %v5988_v33  ;;  %v1953_v58 = vrot.slane %v6040_v32, %v5991_v34  ;;  %v1957_v59 = vrot.slane %v6040_v32, %v5994_v35 }
 0x37c   : > { %v5352_v61 = vpop.eup %5351  ;;  %v2943_v62 = vrot.slane %v2929_v17, %v6003_v14  ;;  %5363 = vpow2.f32 %v4835_v52  ;;  %v1961_v63 = vrot.slane %v6040_v32, %v5997_v38  ;;  %v1965_v0 = vrot.slane %v6040_v32, %v6000_v39 }
 0x37d   : > { %v6140_v2 = vpop.eup %5353  ;;  %v1665_v4 = vadd.f32 1.0, %v5352_v61  ;;  %5365 = vpow2.f32 %v4844_v55  ;;  %v3043_v5 = vcombine.low %v1937_v49, %v1941_v44  ;;  %v3044_v6 = vcombine.low %v1945_v10, %v1949_v57 }
 0x37e   : > { %v2944_v7 = vcombine.low %v2936_v51, %v2943_v62  ;;  %v3045_v8 = vcombine.low %v1953_v58, %v1957_v59  ;;  %v3046_v12 = vcombine.low %v1961_v63, %v1965_v0  ;;  %v1532_v13 = vadd.f32 %v5964_v50, %v1464_v60 }
 0x37f   : > { %v6143_v16 = vpop.eup %5355  ;;  %5367 = vrcp.f32 %v1665_v4  ;;  %v3053_v19 = vrot.slane %v3043_v5, %v6003_v14  ;;  %v3060_v20 = vrot.slane %v3044_v6, %v6003_v14  ;;  %v1543_v32 = vadd.f32 %v5964_v50, %v1497_v1 }
 0x380   : > { %4373 = vperm.xlu1 %5285, %v2944_v7   ;;  %v3067_v21 = vrot.slane %v3045_v8, %v6003_v14  ;;  %v3074_v24 = vrot.slane %v3046_v12, %v6003_v14  ;;  %v4836_v25 = vmul.f32 -1.442695, %v1532_v13  ;;  %v1905_v15 = vrot.slane %v6049_v48, %v5978_v28 }
 0x381   : > { %v6152_v26 = vpop.eup %5357  ;;  %v3075_v27 = vcombine.low %v3053_v19, %v3060_v20  ;;  %v4847_v29 = vmul.f32 -1.442695, %v1543_v32  ;;  %v1909_v23 = vrot.slane %v6049_v48, %v5982_v30  ;;  %v1913_v22 = vrot.slane %v6049_v48, %v5985_v31 }
 0x382   : > { %v3076_v37 = vcombine.low %v3067_v21, %v3074_v24  ;;  %5369 = vpow2.f32 %v4836_v25  ;;  %v1917_v41 = vrot.slane %v6049_v48, %v5988_v33  ;;  %v1921_v42 = vrot.slane %v6049_v48, %v5991_v34 }
 0x383   : > { %v6162_v46 = vpop.eup %5359  ;;  %v3083_v49 = vrot.slane %v3075_v27, %v6003_v14  ;;  %5371 = vpow2.f32 %v4847_v29  ;;  %v1925_v44 = vrot.slane %v6049_v48, %v5994_v35  ;;  %v1929_v10 = vrot.slane %v6049_v48, %v5997_v38  ;;  %v1503_v29 = vpop.xlane.xlu1 %1502 }
 0x384   : > { %v5362_v17 = vpop.eup %5361  ;;  %v3090_v51 = vrot.slane %v3076_v37, %v6003_v14  ;;  %v1933_v52 = vrot.slane %v6049_v48, %v6000_v39  ;;  %v2994_v55 = vcombine.low %v1905_v15, %v1909_v23  ;;  %v2995_v57 = vcombine.low %v1913_v22, %v1917_v41 }
 0x385   : > { %v1669_v58 = vadd.f32 1.0, %v5362_v17  ;;  %v2996_v59 = vcombine.low %v1921_v42, %v1925_v44  ;;  %v1533_v60 = vadd.f32 %v5964_v50, %v1467_v43  ;;  %v1542_v61 = vadd.f32 %v5964_v50, %v1494_v45 }
 0x386   : > { %v5364_v62 = vpop.eup %5363  ;;  %v3091_v63 = vcombine.low %v3083_v49, %v3090_v51  ;;  %v2997_v0 = vcombine.low %v1929_v10, %v1933_v52  ;;  %v3004_v1 = vrot.slane %v2994_v55, %v6003_v14  ;;  %v3011_v4 = vrot.slane %v2995_v57, %v6003_v14 }
 0x387   : > { %v5366_v5 = vpop.eup %5365  ;;  %5373 = vrcp.f32 %v1669_v58  ;;  %v1659_v6 = vadd.f32 1.0, %v5364_v62  ;;  %v3018_v48 = vrot.slane %v2996_v59, %v6003_v14  ;;  %v4837_v7 = vmul.f32 -1.442695, %v1533_v60 }
 0x388   : > { %v1668_v8 = vadd.f32 1.0, %v5366_v5  ;;  %4382 = vperm.xlu1 %5285, %v3091_v63   ;;  %v3025_v12 = vrot.slane %v2997_v0, %v6003_v14  ;;  %v3026_v13 = vcombine.low %v3004_v1, %v3011_v4  ;;  %v4846_v19 = vmul.f32 -1.442695, %v1542_v61 }
 0x389   : > { %v6178_v20 = vpop.eup %5367  ;;  %5375 = vrcp.f32 %v1659_v6  ;;  %v2001_v32 = vrot.slane %v6052_v56, %v5978_v28  ;;  %v2005_v21 = vrot.slane %v6052_v56, %v5982_v30  ;;  %v2009_v24 = vrot.slane %v6052_v56, %v5985_v31 }
 0x38a   : > { %5377 = vrcp.f32 %v1668_v8  ;;  %v3027_v25 = vcombine.low %v3018_v48, %v3025_v12  ;;  %v3034_v15 = vrot.slane %v3026_v13, %v6003_v14  ;;  %v2013_v27 = vrot.slane %v6052_v56, %v5988_v33 }
 0x38b   : > { %5379 = vpow2.f32 %v4837_v7  ;;  %v2017_v23 = vrot.slane %v6052_v56, %v5991_v34  ;;  %v2021_v22 = vrot.slane %v6052_v56, %v5994_v35  ;;  %v2025_v37 = vrot.slane %v6052_v56, %v5997_v38 }
 0x38c   : > { %v5370_v41 = vpop.eup %5369  ;;  %v3041_v42 = vrot.slane %v3027_v25, %v6003_v14  ;;  %5381 = vpow2.f32 %v4846_v19  ;;  %v2029_v43 = vrot.slane %v6052_v56, %v6000_v39  ;;  %v3141_v45 = vcombine.low %v2001_v32, %v2005_v21 }
 0x38d   : > { %v5372_v49 = vpop.eup %5371  ;;  %v1660_v44 = vadd.f32 1.0, %v5370_v41  ;;  %v3142_v10 = vcombine.low %v2009_v24, %v2013_v27  ;;  %v3143_v17 = vcombine.low %v2017_v23, %v2021_v22  ;;  %v1545_v51 = vadd.f32 %v5964_v50, %v1503_v29  ;;  %v1500_v24 = vpop.xlane.xlu1 %1499 }
 0x38e   : > { %v1671_v52 = vadd.f32 1.0, %v5372_v49  ;;  %v3042_v55 = vcombine.low %v3034_v15, %v3041_v42  ;;  %v3144_v57 = vcombine.low %v2025_v37, %v2029_v43  ;;  %v3151_v58 = vrot.slane %v3141_v45, %v6003_v14 }
 0x38f   : > { %5383 = vrcp.f32 %v1660_v44  ;;  %v3158_v59 = vrot.slane %v3142_v10, %v6003_v14  ;;  %v3165_v60 = vrot.slane %v3143_v17, %v6003_v14  ;;  %v4849_v61 = vmul.f32 -1.442695, %v1545_v51 }
 0x390   : > { %5385 = vrcp.f32 %v1671_v52  ;;  %4379 = vperm.xlu1 %5285, %v3042_v55   ;;  %v3172_v56 = vrot.slane %v3144_v57, %v6003_v14  ;;  %v1969_v62 = vrot.slane %v6064_v11, %v5978_v28  ;;  %v1973_v63 = vrot.slane %v6064_v11, %v5982_v30 }
 0x391   : > { %v6207_v0 = vpop.eup %5373  ;;  %v3173_v1 = vcombine.low %v3151_v58, %v3158_v59  ;;  %5387 = vpow2.f32 %v4849_v61  ;;  %v1977_v4 = vrot.slane %v6064_v11, %v5985_v31  ;;  %v1981_v5 = vrot.slane %v6064_v11, %v5988_v33 }
 0x392   : > { %v3174_v6 = vcombine.low %v3165_v60, %v3172_v56  ;;  %v1985_v48 = vrot.slane %v6064_v11, %v5991_v34  ;;  %v1989_v7 = vrot.slane %v6064_v11, %v5994_v35  ;;  %v1993_v8 = vrot.slane %v6064_v11, %v5997_v38 }
 0x393   : > { %v6219_v12 = vpop.eup %5375  ;;  %v3181_v13 = vrot.slane %v3173_v1, %v6003_v14  ;;  %v1997_v19 = vrot.slane %v6064_v11, %v6000_v39  ;;  %v3092_v32 = vcombine.low %v1969_v62, %v1973_v63  ;;  %v3093_v21 = vcombine.low %v1977_v4, %v1981_v5  ;;  %v1509_v63 = vpop.xlane.xlu1 %1508 }
 0x394   : > { %v6224_v25 = vpop.eup %5377  ;;  %v3188_v15 = vrot.slane %v3174_v6, %v6003_v14  ;;  %v3094_v27 = vcombine.low %v1985_v48, %v1989_v7  ;;  %v2065_v29 = vrot.slane %v6080_v40, %v5978_v28  ;;  %v2069_v23 = vrot.slane %v6080_v40, %v5982_v30 }
 0x395   : > { %v5380_v22 = vpop.eup %5379  ;;  %v3095_v37 = vcombine.low %v1993_v8, %v1997_v19  ;;  %v3102_v41 = vrot.slane %v3092_v32, %v6003_v14  ;;  %v3109_v11 = vrot.slane %v3093_v21, %v6003_v14  ;;  %v2073_v42 = vrot.slane %v6080_v40, %v5985_v31 }
 0x396   : > { %v5382_v43 = vpop.eup %5381  ;;  %v1661_v45 = vadd.f32 1.0, %v5380_v22  ;;  %v3189_v49 = vcombine.low %v3181_v13, %v3188_v15  ;;  %v3116_v44 = vrot.slane %v3094_v27, %v6003_v14  ;;  %v2077_v10 = vrot.slane %v6080_v40, %v5988_v33 }
 0x397   : > { %v1670_v17 = vadd.f32 1.0, %v5382_v43  ;;  %v3123_v51 = vrot.slane %v3095_v37, %v6003_v14  ;;  %v3124_v52 = vcombine.low %v3102_v41, %v3109_v11  ;;  %v2081_v55 = vrot.slane %v6080_v40, %v5991_v34 }
 0x398   : > { %5389 = vrcp.f32 %v1661_v45  ;;  %4388 = vperm.xlu1 %5285, %v3189_v49   ;;  %v2085_v57 = vrot.slane %v6080_v40, %v5994_v35  ;;  %v2089_v58 = vrot.slane %v6080_v40, %v5997_v38  ;;  %v2093_v59 = vrot.slane %v6080_v40, %v6000_v39  ;;  %v1506_v49 = vpop.xlane.xlu1 %1505 }
 0x399   : > { %v6247_v60 = vpop.eup %5383  ;;  %5391 = vrcp.f32 %v1670_v17  ;;  %v3125_v61 = vcombine.low %v3116_v44, %v3123_v51  ;;  %v3132_v56 = vrot.slane %v3124_v52, %v6003_v14  ;;  %v3239_v62 = vcombine.low %v2065_v29, %v2069_v23 }
 0x39a   : > { %v6250_v1 = vpop.eup %5385  ;;  %v3240_v4 = vcombine.low %v2073_v42, %v2077_v10  ;;  %v3241_v5 = vcombine.low %v2081_v55, %v2085_v57  ;;  %v3242_v6 = vcombine.low %v2089_v58, %v2093_v59  ;;  %v1544_v48 = vadd.f32 %v5964_v50, %v1500_v24 }
 0x39b   : > { %v5388_v7 = vpop.eup %5387  ;;  %v3139_v8 = vrot.slane %v3125_v61, %v6003_v14  ;;  %v3249_v40 = vrot.slane %v3239_v62, %v6003_v14  ;;  %v2033_v13 = vrot.slane %v6093_v54, %v5978_v28  ;;  %v2037_v19 = vrot.slane %v6093_v54, %v5982_v30 }
 0x39c   : > { %v1673_v32 = vadd.f32 1.0, %v5388_v7  ;;  %v3256_v21 = vrot.slane %v3240_v4, %v6003_v14  ;;  %v3263_v15 = vrot.slane %v3241_v5, %v6003_v14  ;;  %v3270_v27 = vrot.slane %v3242_v6, %v6003_v14 }
 0x39d   : > { %v3140_v29 = vcombine.low %v3132_v56, %v3139_v8  ;;  %v4848_v24 = vmul.f32 -1.442695, %v1544_v48  ;;  %v2041_v23 = vrot.slane %v6093_v54, %v5985_v31  ;;  %v2045_v22 = vrot.slane %v6093_v54, %v5988_v33 }
 0x39e   : > { %5393 = vrcp.f32 %v1673_v32  ;;  %v3271_v37 = vcombine.low %v3249_v40, %v3256_v21  ;;  %v3272_v41 = vcombine.low %v3263_v15, %v3270_v27  ;;  %v2049_v11 = vrot.slane %v6093_v54, %v5991_v34  ;;  %v1512_v15 = vpop.xlane.xlu1 %1511 }
 0x39f   : > { %4385 = vperm.xlu1 %5285, %v3140_v29   ;;  %5395 = vpow2.f32 %v4848_v24  ;;  %v2053_v42 = vrot.slane %v6093_v54, %v5994_v35  ;;  %v2057_v43 = vrot.slane %v6093_v54, %v5997_v38  ;;  %v2061_v45 = vrot.slane %v6093_v54, %v6000_v39 }
 0x3a0   : > { %v3279_v44 = vrot.slane %v3271_v37, %v6003_v14  ;;  %v3286_v10 = vrot.slane %v3272_v41, %v6003_v14  ;;  %v3190_v17 = vcombine.low %v2033_v13, %v2037_v19  ;;  %v3191_v51 = vcombine.low %v2041_v23, %v2045_v22 }
 0x3a1   : > { %v3192_v52 = vcombine.low %v2049_v11, %v2053_v42  ;;  %v3193_v55 = vcombine.low %v2057_v43, %v2061_v45  ;;  %v1547_v57 = vadd.f32 %v5964_v50, %v1509_v63  ;;  %v2129_v58 = vrot.slane %v6107_v3, %v5978_v28 }
 0x3a2   : > { %v6279_v59 = vpop.eup %5389  ;;  %v3287_v61 = vcombine.low %v3279_v44, %v3286_v10  ;;  %v3200_v56 = vrot.slane %v3190_v17, %v6003_v14  ;;  %v3207_v54 = vrot.slane %v3191_v51, %v6003_v14  ;;  %v2133_v62 = vrot.slane %v6107_v3, %v5982_v30 }
 0x3a3   : > { %v6285_v4 = vpop.eup %5391  ;;  %v3214_v5 = vrot.slane %v3192_v52, %v6003_v14  ;;  %v3221_v6 = vrot.slane %v3193_v55, %v6003_v14  ;;  %v4851_v63 = vmul.f32 -1.442695, %v1547_v57  ;;  %v2137_v48 = vrot.slane %v6107_v3, %v5985_v31 }
 0x3a4   : > { %4394 = vperm.xlu0 %5286, %v3287_v61   ;;  %v3222_v7 = vcombine.low %v3200_v56, %v3207_v54  ;;  %v2141_v8 = vrot.slane %v6107_v3, %v5988_v33  ;;  %v2145_v40 = vrot.slane %v6107_v3, %v5991_v34  ;;  %v2149_v13 = vrot.slane %v6107_v3, %v5994_v35 }
 0x3a5   : > { %v3223_v19 = vcombine.low %v3214_v5, %v3221_v6  ;;  %5397 = vpow2.f32 %v4851_v63  ;;  %v2153_v32 = vrot.slane %v6107_v3, %v5997_v38  ;;  %v2157_v21 = vrot.slane %v6107_v3, %v6000_v39  ;;  %v1515_v5 = vpop.xlane.xlu1 %1514 }
 0x3a6   : > { %v3230_v27 = vrot.slane %v3222_v7, %v6003_v14  ;;  %v3337_v29 = vcombine.low %v2129_v58, %v2133_v62  ;;  %v3338_v24 = vcombine.low %v2137_v48, %v2141_v8  ;;  %v3339_v23 = vcombine.low %v2145_v40, %v2149_v13 }
 0x3a7   : > { %v3237_v22 = vrot.slane %v3223_v19, %v6003_v14  ;;  %v3340_v37 = vcombine.low %v2153_v32, %v2157_v21  ;;  %v1546_v41 = vadd.f32 %v5964_v50, %v1506_v49  ;;  %v2097_v11 = vrot.slane %v6118_v47, %v5978_v28 }
 0x3a8   : > { %v6306_v42 = vpop.eup %5393  ;;  %v3347_v43 = vrot.slane %v3337_v29, %v6003_v14  ;;  %v3354_v3 = vrot.slane %v3338_v24, %v6003_v14  ;;  %v3361_v45 = vrot.slane %v3339_v23, %v6003_v14  ;;  %v2101_v44 = vrot.slane %v6118_v47, %v5982_v30 }
 0x3a9   : > { %v5396_v10 = vpop.eup %5395  ;;  %v3238_v17 = vcombine.low %v3230_v27, %v3237_v22  ;;  %v3368_v51 = vrot.slane %v3340_v37, %v6003_v14  ;;  %v4850_v52 = vmul.f32 -1.442695, %v1546_v41  ;;  %v2105_v49 = vrot.slane %v6118_v47, %v5985_v31 }
 0x3aa   : > { %v1672_v55 = vadd.f32 1.0, %v5396_v10  ;;  %v3369_v57 = vcombine.low %v3347_v43, %v3354_v3  ;;  %v2109_v58 = vrot.slane %v6118_v47, %v5988_v33  ;;  %v2113_v61 = vrot.slane %v6118_v47, %v5991_v34 }
 0x3ab   : > { %4391 = vperm.xlu1 %5285, %v3238_v17   ;;  %v3370_v56 = vcombine.low %v3361_v45, %v3368_v51  ;;  %5399 = vpow2.f32 %v4850_v52  ;;  %v2117_v54 = vrot.slane %v6118_v47, %v5994_v35  ;;  %v2121_v62 = vrot.slane %v6118_v47, %v5997_v38 }
 0x3ac   : > { %5401 = vrcp.f32 %v1672_v55  ;;  %v3377_v6 = vrot.slane %v3369_v57, %v6003_v14  ;;  %v2125_v63 = vrot.slane %v6118_v47, %v6000_v39  ;;  %v3288_v48 = vcombine.low %v2097_v11, %v2101_v44 }
 0x3ad   : > { %v3384_v7 = vrot.slane %v3370_v56, %v6003_v14  ;;  %v3289_v8 = vcombine.low %v2105_v49, %v2109_v58  ;;  %v3290_v40 = vcombine.low %v2113_v61, %v2117_v54  ;;  %v1548_v13 = vadd.f32 %v5964_v50, %v1512_v15 }
 0x3ae   : > { %v3291_v19 = vcombine.low %v2121_v62, %v2125_v63  ;;  %v3298_v32 = vrot.slane %v3288_v48, %v6003_v14  ;;  %v1549_v21 = vadd.f32 %v5964_v50, %v1515_v5  ;;  %v2321_v27 = vrot.slane %v6152_v26, %v5978_v28 }
 0x3af   : > { %v5398_v29 = vpop.eup %5397  ;;  %v3385_v24 = vcombine.low %v3377_v6, %v3384_v7  ;;  %v3305_v23 = vrot.slane %v3289_v8, %v6003_v14  ;;  %v3312_v47 = vrot.slane %v3290_v40, %v6003_v14  ;;  %v4852_v22 = vmul.f32 -1.442695, %v1548_v13 }
 0x3b0   : > { %v1675_v37 = vadd.f32 1.0, %v5398_v29  ;;  %v3319_v41 = vrot.slane %v3291_v19, %v6003_v14  ;;  %v4853_v11 = vmul.f32 -1.442695, %v1549_v21  ;;  %v2325_v15 = vrot.slane %v6152_v26, %v5982_v30 }
 0x3b1   : > { %4400 = vperm.xlu1 %5285, %v3385_v24   ;;  %v3320_v43 = vcombine.low %v3298_v32, %v3305_v23  ;;  %5403 = vpow2.f32 %v4852_v22  ;;  %v2329_v50 = vrot.slane %v6152_v26, %v5985_v31  ;;  %v2333_v3 = vrot.slane %v6152_v26, %v5988_v33 }
 0x3b2   : > { %5405 = vrcp.f32 %v1675_v37  ;;  %v3321_v45 = vcombine.low %v3312_v47, %v3319_v41  ;;  %v2337_v44 = vrot.slane %v6152_v26, %v5991_v34  ;;  %v2341_v10 = vrot.slane %v6152_v26, %v5994_v35 }
 0x3b3   : > { %v3328_v17 = vrot.slane %v3320_v43, %v6003_v14  ;;  %5407 = vpow2.f32 %v4853_v11  ;;  %v2345_v51 = vrot.slane %v6152_v26, %v5997_v38  ;;  %v2349_v52 = vrot.slane %v6152_v26, %v6000_v39 }
 0x3b4   : > { %v3335_v49 = vrot.slane %v3321_v45, %v6003_v14  ;;  %v3631_v55 = vcombine.low %v2321_v27, %v2325_v15  ;;  %v3632_v57 = vcombine.low %v2329_v50, %v2333_v3  ;;  %v3633_v58 = vcombine.low %v2337_v44, %v2341_v10 }
 0x3b5   : > { %v5400_v61 = vpop.eup %5399  ;;  %v3634_v56 = vcombine.low %v2345_v51, %v2349_v52  ;;  %v2385_v54 = vrot.slane %v6178_v20, %v5978_v28  ;;  %v2389_v62 = vrot.slane %v6178_v20, %v5982_v30  ;;  %v2393_v5 = vrot.slane %v6178_v20, %v5985_v31 }
 0x3b6   : > { %v6358_v6 = vpop.eup %5401  ;;  %v1674_v63 = vadd.f32 1.0, %v5400_v61  ;;  %v3336_v26 = vcombine.low %v3328_v17, %v3335_v49  ;;  %v3641_v48 = vrot.slane %v3631_v55, %v6003_v14  ;;  %v3648_v7 = vrot.slane %v3632_v57, %v6003_v14 }
 0x3b7   : > { %v3655_v8 = vrot.slane %v3633_v58, %v6003_v14  ;;  %v3662_v40 = vrot.slane %v3634_v56, %v6003_v14  ;;  %v2397_v13 = vrot.slane %v6178_v20, %v5988_v33  ;;  %v2401_v19 = vrot.slane %v6178_v20, %v5991_v34 }
 0x3b8   : > { %5409 = vrcp.f32 %v1674_v63  ;;  %4397 = vperm.xlu1 %5285, %v3336_v26   ;;  %v3663_v32 = vcombine.low %v3641_v48, %v3648_v7  ;;  %v2405_v21 = vrot.slane %v6178_v20, %v5994_v35  ;;  %v2409_v27 = vrot.slane %v6178_v20, %v5997_v38 }
 0x3b9   : > { %v3664_v29 = vcombine.low %v3655_v8, %v3662_v40  ;;  %v2413_v24 = vrot.slane %v6178_v20, %v6000_v39  ;;  %v3729_v23 = vcombine.low %v2385_v54, %v2389_v62  ;;  %v3730_v47 = vcombine.low %v2393_v5, %v2397_v13 }
 0x3ba   : > { %v3671_v22 = vrot.slane %v3663_v32, %v6003_v14  ;;  %v3731_v37 = vcombine.low %v2401_v19, %v2405_v21  ;;  %v2449_v41 = vrot.slane %v6143_v16, %v5978_v28  ;;  %v2453_v11 = vrot.slane %v6143_v16, %v5982_v30 }
 0x3bb   : > { %v5404_v15 = vpop.eup %5403  ;;  %v3678_v43 = vrot.slane %v3664_v29, %v6003_v14  ;;  %v3732_v50 = vcombine.low %v2409_v27, %v2413_v24  ;;  %v3739_v3 = vrot.slane %v3729_v23, %v6003_v14  ;;  %v3746_v45 = vrot.slane %v3730_v47, %v6003_v14 }
 0x3bc   : > { %v6382_v20 = vpop.eup %5405  ;;  %v1676_v44 = vadd.f32 1.0, %v5404_v15  ;;  %v3753_v10 = vrot.slane %v3731_v37, %v6003_v14  ;;  %v2457_v17 = vrot.slane %v6143_v16, %v5985_v31  ;;  %v2461_v51 = vrot.slane %v6143_v16, %v5988_v33 }
 0x3bd   : > { %v5408_v52 = vpop.eup %5407  ;;  %v3679_v49 = vcombine.low %v3671_v22, %v3678_v43  ;;  %v3760_v55 = vrot.slane %v3732_v50, %v6003_v14  ;;  %v3761_v57 = vcombine.low %v3739_v3, %v3746_v45  ;;  %v2465_v58 = vrot.slane %v6143_v16, %v5991_v34 }
 0x3be   : > { %5411 = vrcp.f32 %v1676_v44  ;;  %v1677_v61 = vadd.f32 1.0, %v5408_v52  ;;  %v2469_v56 = vrot.slane %v6143_v16, %v5994_v35  ;;  %v2473_v54 = vrot.slane %v6143_v16, %v5997_v38 }
 0x3bf   : > { %4418 = vperm.xlu0 %5286, %v3679_v49   ;;  %v3762_v62 = vcombine.low %v3753_v10, %v3760_v55  ;;  %v3769_v5 = vrot.slane %v3761_v57, %v6003_v14  ;;  %v2477_v63 = vrot.slane %v6143_v16, %v6000_v39  ;;  %v3827_v26 = vcombine.low %v2449_v41, %v2453_v11 }
 0x3c0   : > { %5413 = vrcp.f32 %v1677_v61  ;;  %v3828_v48 = vcombine.low %v2457_v17, %v2461_v51  ;;  %v3829_v7 = vcombine.low %v2465_v58, %v2469_v56  ;;  %v2193_v8 = vrot.slane %v6219_v12, %v5978_v28 }
 0x3c1   : > { %v3776_v40 = vrot.slane %v3762_v62, %v6003_v14  ;;  %v3830_v13 = vcombine.low %v2473_v54, %v2477_v63  ;;  %v3837_v19 = vrot.slane %v3827_v26, %v6003_v14  ;;  %v2197_v32 = vrot.slane %v6219_v12, %v5982_v30 }
 0x3c2   : > { %v6405_v21 = vpop.eup %5409  ;;  %v3844_v27 = vrot.slane %v3828_v48, %v6003_v14  ;;  %v3851_v16 = vrot.slane %v3829_v7, %v6003_v14  ;;  %v2201_v29 = vrot.slane %v6219_v12, %v5985_v31  ;;  %v2205_v24 = vrot.slane %v6219_v12, %v5988_v33 }
 0x3c3   : > { %v3777_v23 = vcombine.low %v3769_v5, %v3776_v40  ;;  %v3858_v47 = vrot.slane %v3830_v13, %v6003_v14  ;;  %v2209_v22 = vrot.slane %v6219_v12, %v5991_v34  ;;  %v2213_v37 = vrot.slane %v6219_v12, %v5994_v35 }
 0x3c4   : > { %v3859_v41 = vcombine.low %v3837_v19, %v3844_v27  ;;  %v2217_v11 = vrot.slane %v6219_v12, %v5997_v38  ;;  %v2221_v15 = vrot.slane %v6219_v12, %v6000_v39  ;;  %v3435_v43 = vcombine.low %v2193_v8, %v2197_v32 }
 0x3c5   : > { %4424 = vperm.xlu0 %5286, %v3777_v23   ;;  %v3860_v50 = vcombine.low %v3851_v16, %v3858_v47  ;;  %v3436_v3 = vcombine.low %v2201_v29, %v2205_v24  ;;  %v3437_v45 = vcombine.low %v2209_v22, %v2213_v37  ;;  %v2513_v44 = vrot.slane %v6207_v0, %v5978_v28 }
 0x3c6   : > { %v3867_v10 = vrot.slane %v3859_v41, %v6003_v14  ;;  %v3438_v17 = vcombine.low %v2217_v11, %v2221_v15  ;;  %v3445_v51 = vrot.slane %v3435_v43, %v6003_v14  ;;  %v2517_v52 = vrot.slane %v6207_v0, %v5982_v30 }
 0x3c7   : > { %v3874_v49 = vrot.slane %v3860_v50, %v6003_v14  ;;  %v3452_v12 = vrot.slane %v3436_v3, %v6003_v14  ;;  %v3459_v55 = vrot.slane %v3437_v45, %v6003_v14  ;;  %v2521_v57 = vrot.slane %v6207_v0, %v5985_v31 }
 0x3c8   : > { %v6433_v58 = vpop.eup %5411  ;;  %v3466_v61 = vrot.slane %v3438_v17, %v6003_v14  ;;  %v2525_v56 = vrot.slane %v6207_v0, %v5988_v33  ;;  %v2529_v54 = vrot.slane %v6207_v0, %v5991_v34  ;;  %v2533_v62 = vrot.slane %v6207_v0, %v5994_v35 }
 0x3c9   : > { %v3875_v5 = vcombine.low %v3867_v10, %v3874_v49  ;;  %v3467_v63 = vcombine.low %v3445_v51, %v3452_v12  ;;  %v2537_v26 = vrot.slane %v6207_v0, %v5997_v38  ;;  %v2541_v48 = vrot.slane %v6207_v0, %v6000_v39 }
 0x3ca   : > { %v6446_v7 = vpop.eup %5413  ;;  %v3468_v8 = vcombine.low %v3459_v55, %v3466_v61  ;;  %v3925_v40 = vcombine.low %v2513_v44, %v2517_v52  ;;  %v3926_v13 = vcombine.low %v2521_v57, %v2525_v56  ;;  %v3927_v19 = vcombine.low %v2529_v54, %v2533_v62 }
 0x3cb   : > { %4430 = vperm.xlu0 %5286, %v3875_v5   ;;  %v3475_v32 = vrot.slane %v3467_v63, %v6003_v14  ;;  %v3928_v27 = vcombine.low %v2537_v26, %v2541_v48  ;;  %v2161_v16 = vrot.slane %v6140_v2, %v5978_v28  ;;  %v2165_v29 = vrot.slane %v6140_v2, %v5982_v30 }
 0x3cc   : > { %v3482_v24 = vrot.slane %v3468_v8, %v6003_v14  ;;  %v3935_v0 = vrot.slane %v3925_v40, %v6003_v14  ;;  %v3942_v23 = vrot.slane %v3926_v13, %v6003_v14  ;;  %v3949_v47 = vrot.slane %v3927_v19, %v6003_v14 }
 0x3cd   : > { %v3956_v22 = vrot.slane %v3928_v27, %v6003_v14  ;;  %v2169_v37 = vrot.slane %v6140_v2, %v5985_v31  ;;  %v2173_v41 = vrot.slane %v6140_v2, %v5988_v33  ;;  %v2177_v11 = vrot.slane %v6140_v2, %v5991_v34 }
 0x3ce   : > { %v3483_v15 = vcombine.low %v3475_v32, %v3482_v24  ;;  %v3957_v43 = vcombine.low %v3935_v0, %v3942_v23  ;;  %v2181_v50 = vrot.slane %v6140_v2, %v5994_v35  ;;  %v2185_v3 = vrot.slane %v6140_v2, %v5997_v38 }
 0x3cf   : > { %v3958_v45 = vcombine.low %v3949_v47, %v3956_v22  ;;  %v2189_v44 = vrot.slane %v6140_v2, %v6000_v39  ;;  %v3386_v10 = vcombine.low %v2161_v16, %v2165_v29  ;;  %v3387_v17 = vcombine.low %v2169_v37, %v2173_v41 }
 0x3d0   : > { %4406 = vperm.xlu1 %5285, %v3483_v15   ;;  %v3965_v51 = vrot.slane %v3957_v43, %v6003_v14  ;;  %v3388_v52 = vcombine.low %v2177_v11, %v2181_v50  ;;  %v2577_v49 = vrot.slane %v6250_v1, %v5978_v28  ;;  %v2581_v12 = vrot.slane %v6250_v1, %v5982_v30 }
 0x3d1   : > { %v3972_v55 = vrot.slane %v3958_v45, %v6003_v14  ;;  %v3389_v57 = vcombine.low %v2185_v3, %v2189_v44  ;;  %v3396_v61 = vrot.slane %v3386_v10, %v6003_v14  ;;  %v3403_v56 = vrot.slane %v3387_v17, %v6003_v14 }
 0x3d2   : > { %v3410_v2 = vrot.slane %v3388_v52, %v6003_v14  ;;  %v2585_v54 = vrot.slane %v6250_v1, %v5985_v31  ;;  %v2589_v62 = vrot.slane %v6250_v1, %v5988_v33  ;;  %v2593_v5 = vrot.slane %v6250_v1, %v5991_v34 }
 0x3d3   : > { %v3973_v63 = vcombine.low %v3965_v51, %v3972_v55  ;;  %v3417_v26 = vrot.slane %v3389_v57, %v6003_v14  ;;  %v3418_v48 = vcombine.low %v3396_v61, %v3403_v56  ;;  %v2597_v8 = vrot.slane %v6250_v1, %v5994_v35 }
 0x3d4   : > { %v2601_v40 = vrot.slane %v6250_v1, %v5997_v38  ;;  %v2605_v13 = vrot.slane %v6250_v1, %v6000_v39  ;;  %v4023_v19 = vcombine.low %v2577_v49, %v2581_v12  ;;  %v4024_v32 = vcombine.low %v2585_v54, %v2589_v62 }
 0x3d5   : > { %4436 = vperm.xlu0 %5286, %v3973_v63   ;;  %v3419_v27 = vcombine.low %v3410_v2, %v3417_v26  ;;  %v3426_v16 = vrot.slane %v3418_v48, %v6003_v14  ;;  %v4025_v29 = vcombine.low %v2593_v5, %v2597_v8  ;;  %v2289_v24 = vrot.slane %v6112_v36, %v5978_v28 }
 0x3d6   : > { %v4026_v0 = vcombine.low %v2601_v40, %v2605_v13  ;;  %v4033_v23 = vrot.slane %v4023_v19, %v6003_v14  ;;  %v4040_v47 = vrot.slane %v4024_v32, %v6003_v14  ;;  %v2293_v22 = vrot.slane %v6112_v36, %v5982_v30 }
 0x3d7   : > { %v3433_v1 = vrot.slane %v3419_v27, %v6003_v14  ;;  %v4047_v37 = vrot.slane %v4025_v29, %v6003_v14  ;;  %v2297_v41 = vrot.slane %v6112_v36, %v5985_v31  ;;  %v2301_v11 = vrot.slane %v6112_v36, %v5988_v33 }
 0x3d8   : > { %v4054_v15 = vrot.slane %v4026_v0, %v6003_v14  ;;  %v4055_v43 = vcombine.low %v4033_v23, %v4040_v47  ;;  %v2305_v50 = vrot.slane %v6112_v36, %v5991_v34  ;;  %v2309_v3 = vrot.slane %v6112_v36, %v5994_v35 }
 0x3d9   : > { %v3434_v45 = vcombine.low %v3426_v16, %v3433_v1  ;;  %v2313_v44 = vrot.slane %v6112_v36, %v5997_v38  ;;  %v2317_v10 = vrot.slane %v6112_v36, %v6000_v39  ;;  %v3582_v17 = vcombine.low %v2289_v24, %v2293_v22 }
 0x3da   : > { %v4056_v51 = vcombine.low %v4047_v37, %v4054_v15  ;;  %v4063_v52 = vrot.slane %v4055_v43, %v6003_v14  ;;  %v3583_v49 = vcombine.low %v2297_v41, %v2301_v11  ;;  %v3584_v12 = vcombine.low %v2305_v50, %v2309_v3 }
 0x3db   : > { %4403 = vperm.xlu1 %5285, %v3434_v45   ;;  %v3585_v55 = vcombine.low %v2313_v44, %v2317_v10  ;;  %v3592_v57 = vrot.slane %v3582_v17, %v6003_v14  ;;  %v2353_v61 = vrot.slane %v6127_v53, %v5978_v28  ;;  %v2357_v56 = vrot.slane %v6127_v53, %v5982_v30 }
 0x3dc   : > { %v4070_v2 = vrot.slane %v4056_v51, %v6003_v14  ;;  %v3599_v36 = vrot.slane %v3583_v49, %v6003_v14  ;;  %v3606_v54 = vrot.slane %v3584_v12, %v6003_v14  ;;  %v2361_v62 = vrot.slane %v6127_v53, %v5985_v31 }
 0x3dd   : > { %v3613_v5 = vrot.slane %v3585_v55, %v6003_v14  ;;  %v2365_v63 = vrot.slane %v6127_v53, %v5988_v33  ;;  %v2369_v26 = vrot.slane %v6127_v53, %v5991_v34  ;;  %v2373_v48 = vrot.slane %v6127_v53, %v5994_v35 }
 0x3de   : > { %v4071_v8 = vcombine.low %v4063_v52, %v4070_v2  ;;  %v3614_v40 = vcombine.low %v3592_v57, %v3599_v36  ;;  %v2377_v13 = vrot.slane %v6127_v53, %v5997_v38  ;;  %v2381_v19 = vrot.slane %v6127_v53, %v6000_v39 }
 0x3df   : > { %v3615_v32 = vcombine.low %v3606_v54, %v3613_v5  ;;  %v3680_v27 = vcombine.low %v2353_v61, %v2357_v56  ;;  %v3681_v16 = vcombine.low %v2361_v62, %v2365_v63  ;;  %v3682_v29 = vcombine.low %v2369_v26, %v2373_v48 }
 0x3e0   : > { %4442 = vperm.xlu0 %5286, %v4071_v8   ;;  %v3622_v24 = vrot.slane %v3614_v40, %v6003_v14  ;;  %v3683_v0 = vcombine.low %v2377_v13, %v2381_v19  ;;  %v2641_v23 = vrot.slane %v6306_v42, %v5978_v28  ;;  %v2645_v47 = vrot.slane %v6306_v42, %v5982_v30 }
 0x3e1   : > { %v3629_v22 = vrot.slane %v3615_v32, %v6003_v14  ;;  %v3690_v1 = vrot.slane %v3680_v27, %v6003_v14  ;;  %v3697_v53 = vrot.slane %v3681_v16, %v6003_v14  ;;  %v3704_v37 = vrot.slane %v3682_v29, %v6003_v14 }
 0x3e2   : > { %v3711_v41 = vrot.slane %v3683_v0, %v6003_v14  ;;  %v2649_v11 = vrot.slane %v6306_v42, %v5985_v31  ;;  %v2653_v15 = vrot.slane %v6306_v42, %v5988_v33  ;;  %v2657_v43 = vrot.slane %v6306_v42, %v5991_v34 }
 0x3e3   : > { %v3630_v50 = vcombine.low %v3622_v24, %v3629_v22  ;;  %v3712_v3 = vcombine.low %v3690_v1, %v3697_v53  ;;  %v2661_v45 = vrot.slane %v6306_v42, %v5994_v35  ;;  %v2665_v44 = vrot.slane %v6306_v42, %v5997_v38 }
 0x3e4   : > { %v3713_v10 = vcombine.low %v3704_v37, %v3711_v41  ;;  %v2669_v17 = vrot.slane %v6306_v42, %v6000_v39  ;;  %v4121_v51 = vcombine.low %v2641_v23, %v2645_v47  ;;  %v4122_v52 = vcombine.low %v2649_v11, %v2653_v15 }
 0x3e5   : > { %4415 = vperm.xlu1 %5285, %v3630_v50   ;;  %v3720_v49 = vrot.slane %v3712_v3, %v6003_v14  ;;  %v4123_v12 = vcombine.low %v2657_v43, %v2661_v45  ;;  %v2417_v55 = vrot.slane %v6162_v46, %v5978_v28  ;;  %v2421_v57 = vrot.slane %v6162_v46, %v5982_v30 }
 0x3e6   : > { %v3727_v61 = vrot.slane %v3713_v10, %v6003_v14  ;;  %v4124_v56 = vcombine.low %v2665_v44, %v2669_v17  ;;  %v4131_v2 = vrot.slane %v4121_v51, %v6003_v14  ;;  %v4138_v36 = vrot.slane %v4122_v52, %v6003_v14 }
 0x3e7   : > { %v4145_v42 = vrot.slane %v4123_v12, %v6003_v14  ;;  %v2425_v54 = vrot.slane %v6162_v46, %v5985_v31  ;;  %v2429_v62 = vrot.slane %v6162_v46, %v5988_v33  ;;  %v2433_v5 = vrot.slane %v6162_v46, %v5991_v34 }
 0x3e8   : > { %v3728_v63 = vcombine.low %v3720_v49, %v3727_v61  ;;  %v4152_v26 = vrot.slane %v4124_v56, %v6003_v14  ;;  %v4153_v48 = vcombine.low %v4131_v2, %v4138_v36  ;;  %v2437_v8 = vrot.slane %v6162_v46, %v5994_v35 }
 0x3e9   : > { %v2441_v40 = vrot.slane %v6162_v46, %v5997_v38  ;;  %v2445_v13 = vrot.slane %v6162_v46, %v6000_v39  ;;  %v3778_v19 = vcombine.low %v2417_v55, %v2421_v57  ;;  %v3779_v32 = vcombine.low %v2425_v54, %v2429_v62 }
 0x3ea   : > { %4421 = vperm.xlu1 %5285, %v3728_v63   ;;  %v4154_v27 = vcombine.low %v4145_v42, %v4152_v26  ;;  %v4161_v16 = vrot.slane %v4153_v48, %v6003_v14  ;;  %v3780_v29 = vcombine.low %v2433_v5, %v2437_v8  ;;  %v2609_v24 = vrot.slane %v6358_v6, %v5978_v28 }
 0x3eb   : > { %v3781_v0 = vcombine.low %v2441_v40, %v2445_v13  ;;  %v3788_v23 = vrot.slane %v3778_v19, %v6003_v14  ;;  %v3795_v47 = vrot.slane %v3779_v32, %v6003_v14  ;;  %v2613_v22 = vrot.slane %v6358_v6, %v5982_v30 }
 0x3ec   : > { %v4168_v46 = vrot.slane %v4154_v27, %v6003_v14  ;;  %v3802_v1 = vrot.slane %v3780_v29, %v6003_v14  ;;  %v2617_v53 = vrot.slane %v6358_v6, %v5985_v31  ;;  %v2621_v37 = vrot.slane %v6358_v6, %v5988_v33 }
 0x3ed   : > { %v3809_v41 = vrot.slane %v3781_v0, %v6003_v14  ;;  %v3810_v11 = vcombine.low %v3788_v23, %v3795_v47  ;;  %v2625_v15 = vrot.slane %v6358_v6, %v5991_v34  ;;  %v2629_v43 = vrot.slane %v6358_v6, %v5994_v35 }
 0x3ee   : > { %v4169_v50 = vcombine.low %v4161_v16, %v4168_v46  ;;  %v2633_v3 = vrot.slane %v6358_v6, %v5997_v38  ;;  %v2637_v45 = vrot.slane %v6358_v6, %v6000_v39  ;;  %v4072_v44 = vcombine.low %v2609_v24, %v2613_v22 }
 0x3ef   : > { %v3811_v10 = vcombine.low %v3802_v1, %v3809_v41  ;;  %v3818_v17 = vrot.slane %v3810_v11, %v6003_v14  ;;  %v4073_v51 = vcombine.low %v2617_v53, %v2621_v37  ;;  %v4074_v52 = vcombine.low %v2625_v15, %v2629_v43 }
 0x3f0   : > { %4448 = vperm.xlu0 %5286, %v4169_v50   ;;  %v4075_v49 = vcombine.low %v2633_v3, %v2637_v45  ;;  %v4082_v12 = vrot.slane %v4072_v44, %v6003_v14  ;;  %v2481_v55 = vrot.slane %v6224_v25, %v5978_v28  ;;  %v2485_v57 = vrot.slane %v6224_v25, %v5982_v30 }
 0x3f1   : > { %v3825_v61 = vrot.slane %v3811_v10, %v6003_v14  ;;  %v4089_v6 = vrot.slane %v4073_v51, %v6003_v14  ;;  %v4096_v56 = vrot.slane %v4074_v52, %v6003_v14  ;;  %v2489_v2 = vrot.slane %v6224_v25, %v5985_v31 }
 0x3f2   : > { %v4103_v36 = vrot.slane %v4075_v49, %v6003_v14  ;;  %v2493_v42 = vrot.slane %v6224_v25, %v5988_v33  ;;  %v2497_v54 = vrot.slane %v6224_v25, %v5991_v34  ;;  %v2501_v62 = vrot.slane %v6224_v25, %v5994_v35 }
 0x3f3   : > { %v3826_v5 = vcombine.low %v3818_v17, %v3825_v61  ;;  %v4104_v63 = vcombine.low %v4082_v12, %v4089_v6  ;;  %v2505_v26 = vrot.slane %v6224_v25, %v5997_v38  ;;  %v2509_v48 = vrot.slane %v6224_v25, %v6000_v39 }
 0x3f4   : > { %v4105_v8 = vcombine.low %v4096_v56, %v4103_v36  ;;  %v3876_v40 = vcombine.low %v2481_v55, %v2485_v57  ;;  %v3877_v13 = vcombine.low %v2489_v2, %v2493_v42  ;;  %v3878_v19 = vcombine.low %v2497_v54, %v2501_v62 }
 0x3f5   : > { %4427 = vperm.xlu1 %5285, %v3826_v5   ;;  %v4112_v32 = vrot.slane %v4104_v63, %v6003_v14  ;;  %v3879_v27 = vcombine.low %v2505_v26, %v2509_v48  ;;  %v2705_v16 = vrot.slane %v6382_v20, %v5978_v28  ;;  %v2709_v29 = vrot.slane %v6382_v20, %v5982_v30 }
 0x3f6   : > { %v4119_v24 = vrot.slane %v4105_v8, %v6003_v14  ;;  %v3886_v0 = vrot.slane %v3876_v40, %v6003_v14  ;;  %v3893_v25 = vrot.slane %v3877_v13, %v6003_v14  ;;  %v3900_v23 = vrot.slane %v3878_v19, %v6003_v14 }
 0x3f7   : > { %v3907_v47 = vrot.slane %v3879_v27, %v6003_v14  ;;  %v2713_v22 = vrot.slane %v6382_v20, %v5985_v31  ;;  %v2717_v46 = vrot.slane %v6382_v20, %v5988_v33  ;;  %v2721_v1 = vrot.slane %v6382_v20, %v5991_v34 }
 0x3f8   : > { %v4120_v53 = vcombine.low %v4112_v32, %v4119_v24  ;;  %v3908_v37 = vcombine.low %v3886_v0, %v3893_v25  ;;  %v2725_v41 = vrot.slane %v6382_v20, %v5994_v35  ;;  %v2729_v11 = vrot.slane %v6382_v20, %v5997_v38 }
 0x3f9   : > { %v3909_v15 = vcombine.low %v3900_v23, %v3907_v47  ;;  %v2733_v43 = vrot.slane %v6382_v20, %v6000_v39  ;;  %v4219_v50 = vcombine.low %v2705_v16, %v2709_v29  ;;  %v4220_v3 = vcombine.low %v2713_v22, %v2717_v46 }
 0x3fa   : > { %4445 = vperm.xlu0 %5286, %v4120_v53   ;;  %v3916_v45 = vrot.slane %v3908_v37, %v6003_v14  ;;  %v4221_v44 = vcombine.low %v2721_v1, %v2725_v41  ;;  %v2545_v10 = vrot.slane %v6285_v4, %v5978_v28  ;;  %v2549_v17 = vrot.slane %v6285_v4, %v5982_v30 }
 0x3fb   : > { %v3923_v51 = vrot.slane %v3909_v15, %v6003_v14  ;;  %v4222_v52 = vcombine.low %v2729_v11, %v2733_v43  ;;  %v4229_v49 = vrot.slane %v4219_v50, %v6003_v14  ;;  %v4236_v12 = vrot.slane %v4220_v3, %v6003_v14 }
 0x3fc   : > { %v4243_v20 = vrot.slane %v4221_v44, %v6003_v14  ;;  %v2553_v55 = vrot.slane %v6285_v4, %v5985_v31  ;;  %v2557_v57 = vrot.slane %v6285_v4, %v5988_v33  ;;  %v2561_v61 = vrot.slane %v6285_v4, %v5991_v34 }
 0x3fd   : > { %v3924_v6 = vcombine.low %v3916_v45, %v3923_v51  ;;  %v4250_v56 = vrot.slane %v4222_v52, %v6003_v14  ;;  %v4251_v2 = vcombine.low %v4229_v49, %v4236_v12  ;;  %v2565_v36 = vrot.slane %v6285_v4, %v5994_v35 }
 0x3fe   : > { %v2569_v42 = vrot.slane %v6285_v4, %v5997_v38  ;;  %v2573_v54 = vrot.slane %v6285_v4, %v6000_v39  ;;  %v3974_v62 = vcombine.low %v2545_v10, %v2549_v17  ;;  %v3975_v5 = vcombine.low %v2553_v55, %v2557_v57 }
 0x3ff   : > { %4433 = vperm.xlu1 %5285, %v3924_v6   ;;  %v4252_v63 = vcombine.low %v4243_v20, %v4250_v56  ;;  %v4259_v26 = vrot.slane %v4251_v2, %v6003_v14  ;;  %v3976_v48 = vcombine.low %v2561_v61, %v2565_v36  ;;  %v2673_v8 = vrot.slane %v6405_v21, %v5978_v28 }
 0x400   : > { %v3977_v40 = vcombine.low %v2569_v42, %v2573_v54  ;;  %v3984_v13 = vrot.slane %v3974_v62, %v6003_v14  ;;  %v3991_v19 = vrot.slane %v3975_v5, %v6003_v14  ;;  %v2677_v32 = vrot.slane %v6405_v21, %v5982_v30 }
 0x401   : > { %v4266_v4 = vrot.slane %v4252_v63, %v6003_v14  ;;  %v3998_v27 = vrot.slane %v3976_v48, %v6003_v14  ;;  %v2681_v16 = vrot.slane %v6405_v21, %v5985_v31  ;;  %v2685_v29 = vrot.slane %v6405_v21, %v5988_v33 }
 0x402   : > { %v4005_v24 = vrot.slane %v3977_v40, %v6003_v14  ;;  %v4006_v0 = vcombine.low %v3984_v13, %v3991_v19  ;;  %v2689_v25 = vrot.slane %v6405_v21, %v5991_v34  ;;  %v2693_v23 = vrot.slane %v6405_v21, %v5994_v35 }
 0x403   : > { %v4267_v47 = vcombine.low %v4259_v26, %v4266_v4  ;;  %v2697_v22 = vrot.slane %v6405_v21, %v5997_v38  ;;  %v2701_v46 = vrot.slane %v6405_v21, %v6000_v39  ;;  %v4170_v1 = vcombine.low %v2673_v8, %v2677_v32 }
 0x404   : > { %v4007_v53 = vcombine.low %v3998_v27, %v4005_v24  ;;  %v4014_v37 = vrot.slane %v4006_v0, %v6003_v14  ;;  %v4171_v41 = vcombine.low %v2681_v16, %v2685_v29  ;;  %v4172_v11 = vcombine.low %v2689_v25, %v2693_v23 }
 0x405   : > { %4454 = vperm.xlu0 %5286, %v4267_v47   ;;  %v4173_v15 = vcombine.low %v2697_v22, %v2701_v46  ;;  %v4180_v43 = vrot.slane %v4170_v1, %v6003_v14  ;;  %v2225_v50 = vrot.slane %v6247_v60, %v5978_v28  ;;  %v2229_v3 = vrot.slane %v6247_v60, %v5982_v30 }
 0x406   : > { %v4021_v45 = vrot.slane %v4007_v53, %v6003_v14  ;;  %v4187_v21 = vrot.slane %v4171_v41, %v6003_v14  ;;  %v4194_v44 = vrot.slane %v4172_v11, %v6003_v14  ;;  %v2233_v10 = vrot.slane %v6247_v60, %v5985_v31 }
 0x407   : > { %v4201_v17 = vrot.slane %v4173_v15, %v6003_v14  ;;  %v2237_v51 = vrot.slane %v6247_v60, %v5988_v33  ;;  %v2241_v52 = vrot.slane %v6247_v60, %v5991_v34  ;;  %v2245_v49 = vrot.slane %v6247_v60, %v5994_v35 }
 0x408   : > { %v4022_v12 = vcombine.low %v4014_v37, %v4021_v45  ;;  %v4202_v20 = vcombine.low %v4180_v43, %v4187_v21  ;;  %v2249_v55 = vrot.slane %v6247_v60, %v5997_v38  ;;  %v2253_v57 = vrot.slane %v6247_v60, %v6000_v39 }
 0x409   : > { %v4203_v61 = vcombine.low %v4194_v44, %v4201_v17  ;;  %v3484_v6 = vcombine.low %v2225_v50, %v2229_v3  ;;  %v3485_v56 = vcombine.low %v2233_v10, %v2237_v51  ;;  %v3486_v2 = vcombine.low %v2241_v52, %v2245_v49 }
 0x40a   : > { %4439 = vperm.xlu1 %5285, %v4022_v12   ;;  %v4210_v36 = vrot.slane %v4202_v20, %v6003_v14  ;;  %v3487_v42 = vcombine.low %v2249_v55, %v2253_v57  ;;  %v2737_v54 = vrot.slane %v6433_v58, %v5978_v28  ;;  %v2741_v62 = vrot.slane %v6433_v58, %v5982_v30 }
 0x40b   : > { %v4217_v5 = vrot.slane %v4203_v61, %v6003_v14  ;;  %v3494_v63 = vrot.slane %v3484_v6, %v6003_v14  ;;  %v3501_v60 = vrot.slane %v3485_v56, %v6003_v14  ;;  %v3508_v26 = vrot.slane %v3486_v2, %v6003_v14 }
 0x40c   : > { %v3515_v48 = vrot.slane %v3487_v42, %v6003_v14  ;;  %v2745_v8 = vrot.slane %v6433_v58, %v5985_v31  ;;  %v2749_v40 = vrot.slane %v6433_v58, %v5988_v33  ;;  %v2753_v13 = vrot.slane %v6433_v58, %v5991_v34 }
 0x40d   : > { %v4218_v19 = vcombine.low %v4210_v36, %v4217_v5  ;;  %v3516_v32 = vcombine.low %v3494_v63, %v3501_v60  ;;  %v2757_v4 = vrot.slane %v6433_v58, %v5994_v35  ;;  %v2761_v27 = vrot.slane %v6433_v58, %v5997_v38 }
 0x40e   : > { %v3517_v16 = vcombine.low %v3508_v26, %v3515_v48  ;;  %v2765_v29 = vrot.slane %v6433_v58, %v6000_v39  ;;  %v4268_v24 = vcombine.low %v2737_v54, %v2741_v62  ;;  %v4269_v0 = vcombine.low %v2745_v8, %v2749_v40 }
 0x40f   : > { %4451 = vperm.xlu0 %5286, %v4218_v19   ;;  %v3524_v25 = vrot.slane %v3516_v32, %v6003_v14  ;;  %v4270_v23 = vcombine.low %v2753_v13, %v2757_v4  ;;  %v2257_v47 = vrot.slane %v6279_v59, %v5978_v28  ;;  %v2261_v22 = vrot.slane %v6279_v59, %v5982_v30 }
 0x410   : > { %v3531_v46 = vrot.slane %v3517_v16, %v6003_v14  ;;  %v4271_v1 = vcombine.low %v2761_v27, %v2765_v29  ;;  %v4278_v53 = vrot.slane %v4268_v24, %v6003_v14  ;;  %v4285_v37 = vrot.slane %v4269_v0, %v6003_v14  ;;  %v4371_v27 = vpop.permute.xlu1 %4370 }
 0x411   : > { %v4292_v58 = vrot.slane %v4270_v23, %v6003_v14  ;;  %v2265_v41 = vrot.slane %v6279_v59, %v5985_v31  ;;  %v2269_v11 = vrot.slane %v6279_v59, %v5988_v33  ;;  %v2273_v15 = vrot.slane %v6279_v59, %v5991_v34 }
 0x412   : > { %v3532_v43 = vcombine.low %v3524_v25, %v3531_v46  ;;  %v4299_v50 = vrot.slane %v4271_v1, %v6003_v14  ;;  %v4300_v3 = vcombine.low %v4278_v53, %v4285_v37  ;;  %v2277_v45 = vrot.slane %v6279_v59, %v5994_v35  ;;  %v4368_v46 = vpop.permute.xlu0 %4367 }
 0x413   : > { %v2281_v21 = vrot.slane %v6279_v59, %v5997_v38  ;;  %v2285_v44 = vrot.slane %v6279_v59, %v6000_v39  ;;  %v3533_v10 = vcombine.low %v2257_v47, %v2261_v22  ;;  %v3534_v17 = vcombine.low %v2265_v41, %v2269_v11 }
 0x414   : > { %4409 = vperm.xlu1 %5285, %v3532_v43   ;;  %v4301_v51 = vcombine.low %v4292_v58, %v4299_v50  ;;  %v4308_v52 = vrot.slane %v4300_v3, %v6003_v14  ;;  %v3535_v49 = vcombine.low %v2273_v15, %v2277_v45  ;;  %v2769_v12 = vrot.slane %v6446_v7, %v5978_v28  ;;  %v6786_v16 = vpop.permute.xlu1 %4376 }
 0x415   : > { %v3536_v20 = vcombine.low %v2281_v21, %v2285_v44  ;;  %v3543_v55 = vrot.slane %v3533_v10, %v6003_v14  ;;  %v3550_v57 = vrot.slane %v3534_v17, %v6003_v14  ;;  %v2773_v61 = vrot.slane %v6446_v7, %v5982_v30 }
 0x416   : > { %v4315_v59 = vrot.slane %v4301_v51, %v6003_v14  ;;  %v3557_v6 = vrot.slane %v3535_v49, %v6003_v14  ;;  %v2777_v56 = vrot.slane %v6446_v7, %v5985_v31  ;;  %v2781_v2 = vrot.slane %v6446_v7, %v5988_v33 }
 0x417   : > { %v3564_v28 = vrot.slane %v3536_v20, %v6003_v14  ;;  %v3565_v36 = vcombine.low %v3543_v55, %v3550_v57  ;;  %v2785_v42 = vrot.slane %v6446_v7, %v5991_v34  ;;  %v2789_v54 = vrot.slane %v6446_v7, %v5994_v35 }
 0x418   : > { %v4316_v30 = vcombine.low %v4308_v52, %v4315_v59  ;;  %v2793_v62 = vrot.slane %v6446_v7, %v5997_v38  ;;  %v2797_v5 = vrot.slane %v6446_v7, %v6000_v39  ;;  %v4317_v31 = vcombine.low %v2769_v12, %v2773_v61  ;;  %v4374_v29 = vpop.permute.xlu1 %4373 }
 0x419   : > { %v3566_v63 = vcombine.low %v3557_v6, %v3564_v28  ;;  %v3573_v33 = vrot.slane %v3565_v36, %v6003_v14  ;;  %v4318_v60 = vcombine.low %v2777_v56, %v2781_v2  ;;  %v4319_v26 = vcombine.low %v2785_v42, %v2789_v54 }
 0x41a   : > { %4457 = vperm.xlu0 %5286, %v4316_v30   ;;  %v4320_v48 = vcombine.low %v2793_v62, %v2797_v5  ;;  %v4327_v34 = vrot.slane %v4317_v31, %v6003_v14  ;;  %v6811_v3 = vand.u32 127, %v1774_v9 }
 0x41b   : > { %v3580_v8 = vrot.slane %v3566_v63, %v6003_v14  ;;  %v4334_v35 = vrot.slane %v4318_v60, %v6003_v14  ;;  %v4341_v40 = vrot.slane %v4319_v26, %v6003_v14 }
 0x41c   : > { %v4348_v38 = vrot.slane %v4320_v48, %v6003_v14  ;;  %v6788_v24 = vpop.permute.xlu1 %4382  ;;  %v4475_v21 = vadd.s32 4294967280, %v6811_v3  ;;  %v4468_v44 = vadd.s32 4294967288, %v6811_v3  ;;  %v4466_v17 = vsub.s32 %v6811_v3, %v5974_v18 }
 0x41d   : > { %v3581_v13 = vcombine.low %v3573_v33, %v3580_v8  ;;  %v4349_v39 = vcombine.low %v4327_v34, %v4334_v35  ;;  %v4489_v49 = vadd.s32 4294967264, %v6811_v3  ;;  %v4482_v20 = vadd.s32 4294967272, %v6811_v3 }
 0x41e   : > { %v4350_v7 = vcombine.low %v4341_v40, %v4348_v38  ;;  %v4478_v52 = vsub.s32 %v4475_v21, %v5974_v18  ;;  %v4471_v12 = vsub.s32 %v4468_v44, %v5974_v18  ;;  %v4496_v61 = vadd.s32 4294967256, %v6811_v3 }
 0x41f   : > { %4412 = vperm.xlu1 %5285, %v3581_v13   ;;  %v4357_v19 = vrot.slane %v4349_v39, %v6003_v14  ;;  %v4467_v6 = vrot.slane %v4368_v46, %v4466_v17  ;;  %v4492_v56 = vsub.s32 %v4489_v49, %v5974_v18  ;;  %v4503_v2 = vadd.s32 4294967248, %v6811_v3 }
 0x420   : > { %v4364_v32 = vrot.slane %v4350_v7, %v6003_v14  ;;  %v6790_v0 = vpop.permute.xlu1 %4379  ;;  %v4485_v36 = vsub.s32 %v4482_v20, %v5974_v18  ;;  %v4479_v42 = vrot.slane %v4374_v29, %v4478_v52  ;;  %v4472_v62 = vrot.slane %v4371_v27, %v4471_v12 }
 0x421   : > { %v4499_v63 = vsub.s32 %v4496_v61, %v5974_v18  ;;  %v4510_v26 = vadd.s32 4294967240, %v6811_v3  ;;  %v4506_v48 = vsub.s32 %v4503_v2, %v5974_v18  ;;  %v4517_v34 = vadd.s32 4294967232, %v6811_v3 }
 0x422   : > { %v4365_v4 = vcombine.low %v4357_v19, %v4364_v32  ;;  %v4474_v60 = vsel %vm4473_vm2, %v4472_v62, %v4467_v6  ;;  %v4493_v35 = vrot.slane %v6790_v0, %v4492_v56  ;;  %v4486_v38 = vrot.slane %v6786_v16, %v4485_v36 }
 0x423   : > { %v6800_v1 = vpop.permute.xlu0 %4394  ;;  %v4481_v8 = vsel %vm4480_vm3, %v4479_v42, %v4474_v60  ;;  %v4513_v27 = vsub.s32 %v4510_v26, %v5974_v18  ;;  %v4520_v29 = vsub.s32 %v4517_v34, %v5974_v18  ;;  %v4524_v0 = vadd.s32 4294967224, %v6811_v3 }
 0x424   : > { %4460 = vperm.xlu0 %5286, %v4365_v4   ;;  %v6792_v25 = vpop.permute.xlu1 %4388  ;;  %v4488_v4 = vsel %vm4487_vm4, %v4486_v38, %v4481_v8  ;;  %v4531_v16 = vadd.s32 4294967216, %v6811_v3  ;;  %v4566_v62 = vadd.s32 4294967176, %v6811_v3 }
 0x425   : > { %v4495_v46 = vsel %vm4494_vm5, %v4493_v35, %v4488_v4 }
 0x426   : > { %v4534_v20 = vsub.s32 %v4531_v16, %v5974_v18 }
 0x428   : > { %v6794_v23 = vpop.permute.xlu1 %4385 }
 0x42c   : > { %v6796_v47 = vpop.permute.xlu1 %4391 }
 0x430   : > { %v6798_v22 = vpop.permute.xlu1 %4400 }
 0x437   : > { %v6802_v53 = vpop.permute.xlu1 %4397 }
 0x438   : > { %v4535_v2 = vrot.slane %v6802_v53, %v4534_v20 }
 0x43e   : > { %v4419_v37 = vpop.permute.xlu0 %4418 }
 0x43f   : > { %v4580_v59 = vrot.slane %v4419_v37, %v4471_v12  ;;  %v4521_v12 = vrot.slane %v6796_v47, %v4520_v29 }
 0x444   : > { %v4425_v41 = vpop.permute.xlu0 %4424 }
 0x445   : > { %v4590_v33 = vrot.slane %v4425_v41, %v4485_v36  ;;  %v4507_v41 = vrot.slane %v6794_v23, %v4506_v48 }
 0x44a   : > { %v4431_v15 = vpop.permute.xlu0 %4430 }
 0x44b   : > { %v4600_v19 = vrot.slane %v4431_v15, %v4499_v63 }
 0x44f   : > { %v6804_v58 = vpop.permute.xlu1 %4406 }
 0x454   : > { %v6808_v50 = vpop.permute.xlu0 %4436 }
 0x455   : > { %v4610_v21 = vrot.slane %v6808_v50, %v4513_v27  ;;  %v4538_v50 = vadd.s32 4294967208, %v6811_v3 }
 0x45a   : > { %v6806_v11 = vpop.permute.xlu1 %4403 }
 0x45f   : > { %v6815_v10 = vpop.permute.xlu0 %4442 }
 0x464   : > { %v4416_v43 = vpop.permute.xlu1 %4415 }
 0x465   : > { %v4576_v55 = vrot.slane %v4416_v43, %v4466_v17 }
 0x467   : > { %v4581_v54 = vsel %vm4473_vm2, %v4580_v59, %v4576_v55  ;;  %v4552_v59 = vadd.s32 4294967192, %v6811_v3 }
 0x469   : > { %v4422_v45 = vpop.permute.xlu1 %4421  ;;  %v4555_v53 = vsub.s32 %v4552_v59, %v5974_v18 }
 0x46a   : > { %v4585_v57 = vrot.slane %v4422_v45, %v4478_v52  ;;  %v4500_v45 = vrot.slane %v6788_v24, %v4499_v63  ;;  %v4545_v52 = vadd.s32 4294967200, %v6811_v3  ;;  %v4514_v24 = vrot.slane %v6792_v25, %v4513_v27 }
 0x46b   : > { %v4559_v25 = vadd.s32 4294967184, %v6811_v3  ;;  %v4569_v3 = vsub.s32 %v4566_v62, %v5974_v18 }
 0x46c   : > { %v4586_v5 = vsel %vm4480_vm3, %v4585_v57, %v4581_v54  ;;  %v4502_v17 = vsel %vm4501_vm6, %v4500_v45, %v4495_v46  ;;  %v4548_v6 = vsub.s32 %v4545_v52, %v5974_v18 }
 0x46d   : > { %v4591_v40 = vsel %vm4487_vm4, %v4590_v33, %v4586_v5  ;;  %v4509_v23 = vsel %vm4508_vm7, %v4507_v41, %v4502_v17 }
 0x46e   : > { %v4516_v61 = vsel %vm4515_vm8, %v4514_v24, %v4509_v23  ;;  %v4549_v60 = vrot.slane %v6806_v11, %v4548_v6 }
 0x46f   : > { %v6826_v28 = vpop.permute.xlu0 %4448  ;;  %v4523_v47 = vsel %vm4522_vm9, %v4521_v12, %v4516_v61 }
 0x474   : > { %v4428_v51 = vpop.permute.xlu1 %4427 }
 0x475   : > { %v4595_v31 = vrot.slane %v4428_v51, %v4492_v56  ;;  %v4527_v51 = vsub.s32 %v4524_v0, %v5974_v18 }
 0x477   : > { %v4596_v13 = vsel %vm4494_vm5, %v4595_v31, %v4591_v40  ;;  %v4620_v57 = vrot.slane %v6815_v10, %v4527_v51  ;;  %v4528_v54 = vrot.slane %v6800_v1, %v4527_v51  ;;  %v4541_v10 = vsub.s32 %v4538_v50, %v5974_v18 }
 0x478   : > { %v4601_v37 = vsel %vm4501_vm6, %v4600_v19, %v4596_v13  ;;  %v4562_v1 = vsub.s32 %v4559_v25, %v5974_v18 }
 0x479   : > { %v4446_v39 = vpop.permute.xlu0 %4445  ;;  %v4530_v31 = vsel %vm4529_vm10, %v4528_v54, %v4523_v47  ;;  %v4630_v63 = vrot.slane %v6826_v28, %v4541_v10  ;;  %v4542_v26 = vrot.slane %v6798_v22, %v4541_v10 }
 0x47a   : > { %v4625_v36 = vrot.slane %v4446_v39, %v4534_v20  ;;  %v4537_v33 = vsel %vm4536_vm11, %v4535_v2, %v4530_v31  ;;  %v4556_v39 = vrot.slane %v6804_v58, %v4555_v53 }
 0x47b   : > { %v4544_v35 = vsel %vm4543_vm12, %v4542_v26, %v4537_v33 }
 0x47c   : > { %v4551_v38 = vsel %vm4550_vm13, %v4549_v60, %v4544_v35 }
 0x47d   : > { %v4558_v22 = vsel %vm4557_vm14, %v4556_v39, %v4551_v38 }
 0x47e   : > { %v4434_v30 = vpop.permute.xlu1 %4433 }
 0x47f   : > { %v4605_v7 = vrot.slane %v4434_v30, %v4506_v48 }
 0x481   : > { %v4606_v43 = vsel %vm4508_vm7, %v4605_v7, %v4601_v37 }
 0x482   : > { %v4611_v49 = vsel %vm4515_vm8, %v4610_v21, %v4606_v43 }
 0x484   : > { %v4455_v44 = vpop.permute.xlu0 %4454 }
 0x485   : > { %v4640_v11 = vrot.slane %v4455_v44, %v4555_v53 }
 0x489   : > { %v4440_v32 = vpop.permute.xlu1 %4439 }
 0x48a   : > { %v4615_v15 = vrot.slane %v4440_v32, %v4520_v29 }
 0x48c   : > { %v4616_v55 = vsel %vm4522_vm9, %v4615_v15, %v4611_v49 }
 0x48d   : > { %v4621_v56 = vsel %vm4529_vm10, %v4620_v57, %v4616_v55 }
 0x48e   : > { %v4452_v42 = vpop.permute.xlu0 %4451  ;;  %v4626_v5 = vsel %vm4536_vm11, %v4625_v36, %v4621_v56 }
 0x48f   : > { %v4631_v48 = vsel %vm4543_vm12, %v4630_v63, %v4626_v5  ;;  %v4635_v34 = vrot.slane %v4452_v42, %v4548_v6 }
 0x491   : > { %v4636_v28 = vsel %vm4550_vm13, %v4635_v34, %v4631_v48 }
 0x492   : > { %v4641_v32 = vsel %vm4557_vm14, %v4640_v11, %v4636_v28 }
 0x493   : > { %v4410_v30 = vpop.permute.xlu1 %4409 }
 0x494   : > { %v4563_v13 = vrot.slane %v4410_v30, %v4562_v1 }
 0x496   : > { %v4565_v18 = vsel %vm4564_vm15, %v4563_v13, %v4558_v22 }
 0x499   : > { %v4458_v8 = vpop.permute.xlu0 %4457 }
 0x49a   : > { %v4645_v19 = vrot.slane %v4458_v8, %v4562_v1 }
 0x49c   : > { %v4646_v46 = vsel %vm4564_vm15, %v4645_v19, %v4641_v32 }
 0x49e   : > { %v4413_v40 = vpop.permute.xlu1 %4412 }
 0x49f   : > { %v4570_v7 = vrot.slane %v4413_v40, %v4569_v3 }
 0x4a1   : > { %v4572_v27 = vsel %vm4571_vm0, %v4570_v7, %v4565_v18 }
 0x4a3   : > { %v4461_v4 = vpop.permute.xlu0 %4460 }
 0x4a4   : > { %v4650_v29 = vrot.slane %v4461_v4, %v4569_v3 }
 0x4a6   : > { %v4651_v0 = vsel %vm4571_vm0, %v4650_v29, %v4646_v46 }
 0x4a7   : > { %v4652_v37 = vcombine.low %v4572_v27, %v4651_v0 }
 0x4a9   : > { %v4659_v58 = vrot.slane %v4652_v37, %v6003_v14 }
 0x4ab   : > { %v4666_v41 = vrot.slane %v4659_v58, %v6003_v14 }
 0x4ad   : > { %4672 = vst.msk [vmem:[%s327_s15] sm:$0x3] %vm4670_vm1, %v4666_v41 }
 0x4ae   : > { %5428 = shalt.err (!%p5425_p3)
}
 0x4af   : > { %s5429_s28 = scalar_lea.hbm %s6881_s22, 32  ;;  %s5433_s10 = scalar_lea.hbm %s6932_s9, 64 }
 0x4b0   : > { %p5430_p4 = scmp.ne.s32.totalorder %s6881_s22, %s5429_s28  ;;  %p5434_p9 = scmp.lt.u32.totalorder %s6881_s22, %s6932_s9 }
 0x4b1   : > { %p5435_p10 = scmp.lt.u32.totalorder %s5433_s10, %s5429_s28  ;;  %p5437_p12 = scmp.lt.u32.totalorder %s5429_s28, %s6881_s22 }
 0x4b2   : > { %p5431_p7 = pnand %p5430_p4, %p5570_p5 }
 0x4b3   : > { %p5436_p11 = por %p5435_p10, %p5434_p9 }
 0x4b4   : > { %p5432_p8 = pneg %p5431_p7 }
 0x4b5   : > { %p5438_p13 = por %p5437_p12, %p5436_p11 }
 0x4b7   : > { %p5439_p0 = pnand %p5438_p13, %p5432_p8 }
 0x4b9   : > { %5442 = shalt.err (!%p5439_p0)
}
 0x4ba   : > { %5244 = dma.vmem_to_hbm [thread:$0]  (%p5570_p5), %s6883_s17, 32, %s6881_s22, %s4674_s8  }
 0x4bb PF: > { %p5250_p1 = scmp.ge.s32.totalorder %s5477_s14, 2  ;;  %s4700_s18 = sand.u32 1, %s5465_s11  }
 0x4bc   : > { %s4701_s23 = scalar_lea.sflag [#allocation4], %s4700_s18 }
 0x4bd   : > { %p5247_p2 = pnand %p5250_p1, %p5574_p6 }
 0x4bf   : > { %5460 = dma.done.wait (!%p5247_p2), %s4701_s23, 32  }
 0x4c0   : > { %5462 = vsyncadd (!%p5247_p2), %s4701_s23, 4294967264  ;;  %p20_p3 = scmp.ge.s32.totalorder %s5558_s16, 4   ;;  %s6935_s11 = smov %s5469_s12 }
 0x4c1   : > { %s6936_s12 = smov %s5473_s13  ;;  %s6937_s13 = smov %s5568_s19 }
 0x4c2   : > { %s6938_s14 = smov %s5558_s16  ;;  %22 = sbr.rel (!%p20_p3) target bundleno = 5 (0x5), region = 91 }
 0x4c9   :  { %4706 = vsyncpa [#allocation4], 1 }
 0x4ca   :  { %4708 = vsyncpa [#allocation4 + $0x1], 1 }

</bundles_post_ra>
